<compile_context>
chip_gen: v6e
topology: v6e:2x2x1
jax: 0.10.0
libtpu: 0.0.40
codegen_flags: <defaults>
</compile_context>

<pallas_src>
import math
import jax
import jax.numpy as jnp
import numpy as np
from jax.experimental import pallas as pl
from jax.experimental.pallas import tpu as pltpu

B, T, C = 2, 8, 32          # batch, time, model size
H, DK = 4, 8                # attention heads, head dim (H*DK == C)
HID = 64                    # feed-forward hidden size (linear_units)
K = 7                       # depthwise conv kernel size (odd, non-causal)

# ---- packed-parameter layout: one 128-lane tile per tensor -------------------
LANE = 128
# weights with C rows
WC_QKV, WC_POS, WC_OUT, WC_M1, WC_P1, WC_P2, WC_F1 = range(7)
# weights with HID rows
WH_M2, WH_F2 = range(2)
# bias / vector parameters (1 row each)
BV_M1, BV_M2, BV_QKV, BV_U, BV_V, BV_O, BV_P1, BV_DW, BV_P2, BV_F1, BV_F2 = range(11)


def _swish(v):
    return v * jax.nn.sigmoid(v)


def reconformer_kernel(x_ref, pos_ref, keep_ref, padk_ref,
                       wc_ref, wh_ref, b_ref, dww_ref, eps_ref, out_ref):
    f32 = jnp.float32
    BT = B * T

    x = x_ref[...]                          # (BT, C)
    pos = pos_ref[...]                      # (T, C)
    keep = keep_ref[...]                    # (B, 1, T) multiplicative key mask {0,1}
    padk = padk_ref[...]                    # (BT, 1)   conv padding mask {0,1}
    negm = (1.0 - keep) * (-1e30)           # additive attention mask (0 / -1e30)

    # tile-aligned static slices out of the packed parameter refs
    def wc(tile, width):
        return wc_ref[:, tile * LANE: tile * LANE + width]

    def wh(tile, width):
        return wh_ref[:, tile * LANE: tile * LANE + width]

    def bias(tile, width):
        return b_ref[:, tile * LANE: tile * LANE + width]

    # ---------------- macaron feed-forward (dropout = identity in eval) ------
    hm = _swish(jnp.dot(x, wc(WC_M1, HID), preferred_element_type=f32) + bias(BV_M1, HID))
    x = x + jnp.dot(hm, wh(WH_M2, C), preferred_element_type=f32) + bias(BV_M2, C)

    # ---------------- relative-position multi-head self-attention ------------
    qkv = jnp.dot(x, wc(WC_QKV, 3 * C), preferred_element_type=f32) + bias(BV_QKV, 3 * C)
    q = qkv[:, 0:C]
    k = qkv[:, C:2 * C]
    v = qkv[:, 2 * C:3 * C]
    p = jnp.dot(pos, wc(WC_POS, C), preferred_element_type=f32)        # (T, C)

    qu3 = (q + bias(BV_U, C)).reshape(B, T, C)    # q + pos_bias_u (head-major flat)
    qv2 = q + bias(BV_V, C)                       # q + pos_bias_v, kept 2-D
    k3 = k.reshape(B, T, C)
    v3 = v.reshape(B, T, C)

    inv_sqrt_dk = 1.0 / math.sqrt(DK)
    ctx_heads = []
    for hh in range(H):
        sl = slice(hh * DK, (hh + 1) * DK)
        # content-content term: per-batch batched matmul
        ac = jnp.einsum("btd,bsd->bts", qu3[:, :, sl], k3[:, :, sl],
                        preferred_element_type=f32)                    # (B,T,T)
        # content-position term: pos is shared across the batch -> one 2-D matmul
        bd = jnp.einsum("td,sd->ts", qv2[:, sl], p[:, sl],
                        preferred_element_type=f32).reshape(B, T, T)
        s = (ac + bd) * inv_sqrt_dk + negm
        m = jnp.max(s, axis=-1, keepdims=True)
        e = jnp.exp(s - m)
        attn = e * pl.reciprocal(jnp.sum(e, axis=-1, keepdims=True), approx=True)
        attn = attn * keep                                              # zero masked keys
        ctx = jnp.einsum("bts,bsd->btd", attn, v3[:, :, sl],
                         preferred_element_type=f32)                    # (B,T,DK)
        ctx_heads.append(ctx)
    ctx_all = jnp.concatenate(ctx_heads, axis=-1).reshape(BT, C)        # head-major
    x = x + jnp.dot(ctx_all, wc(WC_OUT, C), preferred_element_type=f32) + bias(BV_O, C)

    # ---------------- convolution module --------------------------------------
    residual = x
    xc = x * padk
    h1 = jnp.dot(xc, wc(WC_P1, 2 * C), preferred_element_type=f32) + bias(BV_P1, 2 * C)
    g = h1[:, 0:C] * jax.nn.sigmoid(h1[:, C:2 * C])                     # GLU

    # depthwise conv: zero-padded shifts along time (static sublane slices, no MXU)
    pad = (K - 1) // 2
    g3 = g.reshape(B, T, C)
    zpad = jnp.zeros((B, pad, C), f32)
    gp = jnp.concatenate([zpad, g3, zpad], axis=1)                      # (B, T+2*pad, C)
    dww = dww_ref[...]                                                  # (K,1,C), BN-folded
    y3 = jnp.zeros((B, T, C), f32)
    for kk in range(K):
        y3 = y3 + gp[:, kk:kk + T, :] * dww[kk]
    y = y3.reshape(BT, C) + bias(BV_DW, C)          # depthwise bias + BN (folded)
    y = _swish(y)
    y = jnp.dot(y, wc(WC_P2, C), preferred_element_type=f32) + bias(BV_P2, C)
    y = y * padk
    x = residual + y

    # ---------------- feed-forward ---------------------------------------------
    hf = _swish(jnp.dot(x, wc(WC_F1, HID), preferred_element_type=f32) + bias(BV_F1, HID))
    x = x + jnp.dot(hf, wh(WH_F2, C), preferred_element_type=f32) + bias(BV_F2, C)

    # ---------------- balancer (identity in forward) + BasicNorm ---------------
    denom = jnp.mean(x * x, axis=-1, keepdims=True) + eps_ref[0, 0]
    x = x * jax.lax.rsqrt(denom)

    # alpha == 1.0 in eval mode -> no blending with x_orig
    out_ref[...] = x.astype(out_ref.dtype)


def make_params(key):
    keys = jax.random.split(key, 24)
    kit = iter(keys)

    def w(shape, scale=0.1):
        return (scale * jax.random.normal(next(kit), shape)).astype(jnp.float32)

    p = {}
    # macaron FFN
    p["wm1"], p["bm1"] = w((C, HID)), w((1, HID))
    p["wm2"], p["bm2"] = w((HID, C)), w((1, C))
    # attention: fused QKV (columns head-major per projection), pos proj, out proj
    p["wqkv"], p["bqkv"] = w((C, 3 * C)), w((1, 3 * C))
    p["wp"] = w((C, C))                                  # linear_pos (no bias)
    p["pbu"], p["pbv"] = w((1, C)), w((1, C))            # pos_bias_u / _v, head-major flat
    p["wo"], p["bo"] = w((C, C)), w((1, C))
    # conv module: pointwise_conv1 (GLU halves packed), depthwise, BN(eval), pointwise_conv2
    p["p1w"], p["p1b"] = w((C, 2 * C)), w((1, 2 * C))
    p["dww"], p["dwb"] = w((K, 1, C)), w((1, C))
    p["bns"] = (1.0 + 0.1 * jax.random.normal(next(kit), (1, C))).astype(jnp.float32)
    p["bnb"] = (0.1 * jax.random.normal(next(kit), (1, C))).astype(jnp.float32)
    p["p2w"], p["p2b"] = w((C, C)), w((1, C))
    # FFN
    p["wf1"], p["bf1"] = w((C, HID)), w((1, HID))
    p["wf2"], p["bf2"] = w((HID, C)), w((1, C))
    # BasicNorm learned eps parameter (default 0.25); exp() applied at use-site
    p["eps"] = jnp.full((1, 1), 0.25, jnp.float32)
    return p


def _pack_lane_tiles(mats, rows):
    """Place each matrix at a 128-lane-aligned column offset in one array."""
    out = jnp.zeros((rows, LANE * len(mats)), jnp.float32)
    for i, m in enumerate(mats):
        m = jnp.asarray(m, jnp.float32).reshape(rows, -1)
        out = out.at[:, i * LANE:i * LANE + m.shape[-1]].set(m)
    return out


def reconformer_layer(x, mask, pos_emb, mask_pad, params):
    Bc, Tc, Cc = x.shape
    x2 = x.reshape(Bc * Tc, Cc).astype(jnp.float32)
    pos = pos_emb[0].astype(jnp.float32)                                   # (T, C)
    keep = mask.astype(jnp.float32)                                        # (B,1,T)
    padk = jnp.transpose(mask_pad, (0, 2, 1)).astype(jnp.float32).reshape(Bc * Tc, 1)

    # eval-mode BatchNorm folded into the depthwise-conv weights/bias
    dww_eff = params["dww"] * params["bns"][None]                          # (K,1,C)
    dwb_eff = params["dwb"] * params["bns"] + params["bnb"]                # (1,C)
    eps_eff = jnp.exp(params["eps"])                                       # (1,1)

    # pack parameters into few lane-aligned slabs (order MUST match the WC_/WH_/BV_ enums)
    wc_pack = _pack_lane_tiles(
        [params["wqkv"], params["wp"], params["wo"], params["wm1"],
         params["p1w"], params["p2w"], params["wf1"]], C)                  # (C, 7*128)
    wh_pack = _pack_lane_tiles([params["wm2"], params["wf2"]], HID)        # (HID, 2*128)
    bias_pack = _pack_lane_tiles(
        [params["bm1"], params["bm2"], params["bqkv"], params["pbu"], params["pbv"],
         params["bo"], params["p1b"], dwb_eff, params["p2b"],
         params["bf1"], params["bf2"]], 1)                                 # (1, 11*128)

    vmem = pl.BlockSpec(memory_space=pltpu.MemorySpace.VMEM)
    smem = pl.BlockSpec(memory_space=pltpu.MemorySpace.SMEM)

    # Single invocation (no grid): the whole problem is a couple of vregs, so the
    # cost is dominated by fixed overhead + DMA count; packing parameters into 4
    # slabs cuts input DMAs from 27 to 9.
    out2 = pl.pallas_call(
        reconformer_kernel,
        out_shape=jax.ShapeDtypeStruct((Bc * Tc, Cc), jnp.float32),
        in_specs=[vmem] * 8 + [smem],
        out_specs=vmem,
    )(x2, pos, keep, padk, wc_pack, wh_pack, bias_pack, dww_eff, eps_eff)

    return out2.reshape(Bc, Tc, Cc), mask


def ref_forward(x, mask, pos_emb, mask_pad, p):
    """Pure-JAX reference of the same eval-mode forward (unfused layouts)."""
    swish = lambda v: v * jax.nn.sigmoid(v)
    B_, T_, C_ = x.shape
    key_keep = (mask > 0.5)[:, None, :, :]                                  # (B,1,1,T)
    pad_keep = jnp.transpose(mask_pad, (0, 2, 1)).astype(jnp.float32)       # (B,T,1)

    x = x + (swish(x @ p["wm1"] + p["bm1"]) @ p["wm2"] + p["bm2"])

    qkv = x @ p["wqkv"] + p["bqkv"]
    q = qkv[..., :C].reshape(B_, T_, H, DK)
    k = qkv[..., C:2 * C].reshape(B_, T_, H, DK)
    v = qkv[..., 2 * C:].reshape(B_, T_, H, DK)
    pe = (pos_emb[0] @ p["wp"]).reshape(T_, H, DK)
    u = p["pbu"].reshape(H, DK)
    vb = p["pbv"].reshape(H, DK)
    ac = jnp.einsum("bthd,bshd->bhts", q + u, k)
    bd = jnp.einsum("bthd,shd->bhts", q + vb, pe)
    scores = (ac + bd) / math.sqrt(DK)
    scores = jnp.where(key_keep, scores, -1e30)
    attn = jax.nn.softmax(scores, axis=-1)
    attn = jnp.where(key_keep, attn, 0.0)
    ctx = jnp.einsum("bhts,bshd->bthd", attn, v).reshape(B_, T_, C)
    x = x + ctx @ p["wo"] + p["bo"]

    residual = x
    xc = x * pad_keep
    h1 = xc @ p["p1w"] + p["p1b"]
    g = h1[..., :C] * jax.nn.sigmoid(h1[..., C:])
    pad = (K - 1) // 2
    gp = jnp.pad(g, ((0, 0), (pad, pad), (0, 0)))
    y = jnp.zeros_like(g)
    for kk in range(K):
        y = y + gp[:, kk:kk + T_, :] * p["dww"][kk][None]
    y = y + p["dwb"]
    y = swish(y * p["bns"] + p["bnb"])
    y = y @ p["p2w"] + p["p2b"]
    y = y * pad_keep
    x = residual + y

    x = x + (swish(x @ p["wf1"] + p["bf1"]) @ p["wf2"] + p["bf2"])
    denom = jnp.mean(x * x, axis=-1, keepdims=True) + jnp.exp(p["eps"][0, 0])
    return x * jax.lax.rsqrt(denom)


if __name__ == "__main__":
    key = jax.random.PRNGKey(0)
    kx, kp, kparam = jax.random.split(key, 3)
    x = jax.random.normal(kx, (B, T, C), jnp.float32)
    pos_emb = jax.random.normal(kp, (1, T, C), jnp.float32)
    # attention key mask (B,1,T) and conv padding mask (B,1,T); 1 = keep.
    mask = jnp.ones((B, 1, T), jnp.float32).at[1, 0, T - 2:].set(0.0)
    mask_pad = jnp.ones((B, 1, T), jnp.float32).at[1, 0, T - 2:].set(0.0)
    params = make_params(kparam)

    out, out_mask = reconformer_layer(x, mask, pos_emb, mask_pad, params)
    out = jax.block_until_ready(out)

    ref = ref_forward(x, mask, pos_emb, mask_pad, params)
    np.testing.assert_allclose(np.asarray(out), np.asarray(ref), rtol=5e-3, atol=5e-3)

    # TODO(synk): dropout / layer-dropout / ActivationBalancer are training-time
    # stochastic or gradient-only ops; they are identity in this eval forward.
    print("KERNEL_OK")
</pallas_src>

<mosaic_0001>
module attributes {stable_mosaic.version = 11 : i64} {
  func.func @reconformer_kernel(%arg0: memref<16x32xf32, #tpu.memory_space<vmem>>, %arg1: memref<8x32xf32, #tpu.memory_space<vmem>>, %arg2: memref<2x1x8xf32, #tpu.memory_space<vmem>>, %arg3: memref<16x1xf32, #tpu.memory_space<vmem>>, %arg4: memref<32x896xf32, #tpu.memory_space<vmem>>, %arg5: memref<64x256xf32, #tpu.memory_space<vmem>>, %arg6: memref<1x1408xf32, #tpu.memory_space<vmem>>, %arg7: memref<7x1x32xf32, #tpu.memory_space<vmem>>, %arg8: memref<1x1xf32, #tpu.memory_space<smem>>, %arg9: memref<16x32xf32, #tpu.memory_space<vmem>>) attributes {dimension_semantics = [], scalar_prefetch = 0 : i64, scratch_operands = 0 : i64, tpu.core_type = #tpu.core_type<tc>} {
    %c0 = arith.constant 0 : index
    %c0_0 = arith.constant 0 : index
    %0 = vector.load %arg0[%c0, %c0_0] : memref<16x32xf32, #tpu.memory_space<vmem>>, vector<16x32xf32>
    %c0_1 = arith.constant 0 : index
    %c0_2 = arith.constant 0 : index
    %1 = vector.load %arg1[%c0_1, %c0_2] : memref<8x32xf32, #tpu.memory_space<vmem>>, vector<8x32xf32>
    %c0_3 = arith.constant 0 : index
    %c0_4 = arith.constant 0 : index
    %c0_5 = arith.constant 0 : index
    %2 = vector.load %arg2[%c0_3, %c0_4, %c0_5] : memref<2x1x8xf32, #tpu.memory_space<vmem>>, vector<2x1x8xf32>
    %c0_6 = arith.constant 0 : index
    %c0_7 = arith.constant 0 : index
    %3 = vector.load %arg3[%c0_6, %c0_7] : memref<16x1xf32, #tpu.memory_space<vmem>>, vector<16x1xf32>
    %cst = arith.constant 1.000000e+00 : f32
    %4 = vector.broadcast %cst : f32 to vector<2x1x8xf32>
    %5 = arith.subf %4, %2 : vector<2x1x8xf32>
    %cst_8 = arith.constant -1.000000e+30 : f32
    %6 = vector.broadcast %cst_8 : f32 to vector<2x1x8xf32>
    %7 = arith.mulf %5, %6 : vector<2x1x8xf32>
    %c0_9 = arith.constant 0 : index
    %c384 = arith.constant 384 : index
    %8 = vector.load %arg4[%c0_9, %c384] : memref<32x896xf32, #tpu.memory_space<vmem>>, vector<32x64xf32>
    %cst_10 = arith.constant dense<0.000000e+00> : vector<16x64xf32>
    %9 = tpu.matmul %0, %8, %cst_10 {dimension_numbers = #tpu.dot_dimension_numbers<[1], [0], [0], [1], [0, 0, 1, 1], [], []>} : vector<16x32xf32>, vector<32x64xf32>, vector<16x64xf32> -> vector<16x64xf32>
    %c0_11 = arith.constant 0 : index
    %c0_12 = arith.constant 0 : index
    %10 = vector.load %arg6[%c0_11, %c0_12] : memref<1x1408xf32, #tpu.memory_space<vmem>>, vector<1x64xf32>
    %11 = vector.broadcast %10 : vector<1x64xf32> to vector<16x64xf32>
    %12 = arith.addf %9, %11 : vector<16x64xf32>
    %13 = arith.negf %12 : vector<16x64xf32>
    %14 = math.exp %13 : vector<16x64xf32>
    %cst_13 = arith.constant 1.000000e+00 : f32
    %15 = vector.broadcast %cst_13 : f32 to vector<16x64xf32>
    %16 = arith.addf %15, %14 : vector<16x64xf32>
    %17 = arith.divf %15, %16 : vector<16x64xf32>
    %18 = arith.mulf %12, %17 : vector<16x64xf32>
    %c0_14 = arith.constant 0 : index
    %c0_15 = arith.constant 0 : index
    %19 = vector.load %arg5[%c0_14, %c0_15] : memref<64x256xf32, #tpu.memory_space<vmem>>, vector<64x32xf32>
    %cst_16 = arith.constant dense<0.000000e+00> : vector<16x32xf32>
    %20 = tpu.matmul %18, %19, %cst_16 {dimension_numbers = #tpu.dot_dimension_numbers<[1], [0], [0], [1], [0, 0, 1, 1], [], []>} : vector<16x64xf32>, vector<64x32xf32>, vector<16x32xf32> -> vector<16x32xf32>
    %21 = arith.addf %0, %20 : vector<16x32xf32>
    %c0_17 = arith.constant 0 : index
    %c128 = arith.constant 128 : index
    %22 = vector.load %arg6[%c0_17, %c128] : memref<1x1408xf32, #tpu.memory_space<vmem>>, vector<1x32xf32>
    %23 = vector.broadcast %22 : vector<1x32xf32> to vector<16x32xf32>
    %24 = arith.addf %21, %23 : vector<16x32xf32>
    %c0_18 = arith.constant 0 : index
    %c0_19 = arith.constant 0 : index
    %25 = vector.load %arg4[%c0_18, %c0_19] : memref<32x896xf32, #tpu.memory_space<vmem>>, vector<32x96xf32>
    %cst_20 = arith.constant dense<0.000000e+00> : vector<16x96xf32>
    %26 = tpu.matmul %24, %25, %cst_20 {dimension_numbers = #tpu.dot_dimension_numbers<[1], [0], [0], [1], [0, 0, 1, 1], [], []>} : vector<16x32xf32>, vector<32x96xf32>, vector<16x96xf32> -> vector<16x96xf32>
    %c0_21 = arith.constant 0 : index
    %c256 = arith.constant 256 : index
    %27 = vector.load %arg6[%c0_21, %c256] : memref<1x1408xf32, #tpu.memory_space<vmem>>, vector<1x96xf32>
    %28 = vector.broadcast %27 : vector<1x96xf32> to vector<16x96xf32>
    %29 = arith.addf %26, %28 : vector<16x96xf32>
    %30 = vector.extract_strided_slice %29 {offsets = [0, 0], sizes = [16, 32], strides = [1, 1]} : vector<16x96xf32> to vector<16x32xf32>
    %31 = vector.extract_strided_slice %29 {offsets = [0, 32], sizes = [16, 32], strides = [1, 1]} : vector<16x96xf32> to vector<16x32xf32>
    %32 = vector.extract_strided_slice %29 {offsets = [0, 64], sizes = [16, 32], strides = [1, 1]} : vector<16x96xf32> to vector<16x32xf32>
    %c0_22 = arith.constant 0 : index
    %c128_23 = arith.constant 128 : index
    %33 = vector.load %arg4[%c0_22, %c128_23] : memref<32x896xf32, #tpu.memory_space<vmem>>, vector<32x32xf32>
    %cst_24 = arith.constant dense<0.000000e+00> : vector<8x32xf32>
    %34 = tpu.matmul %1, %33, %cst_24 {dimension_numbers = #tpu.dot_dimension_numbers<[1], [0], [0], [1], [0, 0, 1, 1], [], []>} : vector<8x32xf32>, vector<32x32xf32>, vector<8x32xf32> -> vector<8x32xf32>
    %c0_25 = arith.constant 0 : index
    %c384_26 = arith.constant 384 : index
    %35 = vector.load %arg6[%c0_25, %c384_26] : memref<1x1408xf32, #tpu.memory_space<vmem>>, vector<1x32xf32>
    %36 = vector.broadcast %35 : vector<1x32xf32> to vector<16x32xf32>
    %37 = arith.addf %30, %36 : vector<16x32xf32>
    %38 = vector.shape_cast %37 : vector<16x32xf32> to vector<2x8x32xf32>
    %c0_27 = arith.constant 0 : index
    %c512 = arith.constant 512 : index
    %39 = vector.load %arg6[%c0_27, %c512] : memref<1x1408xf32, #tpu.memory_space<vmem>>, vector<1x32xf32>
    %40 = vector.broadcast %39 : vector<1x32xf32> to vector<16x32xf32>
    %41 = arith.addf %30, %40 : vector<16x32xf32>
    %42 = vector.shape_cast %31 : vector<16x32xf32> to vector<2x8x32xf32>
    %43 = vector.shape_cast %32 : vector<16x32xf32> to vector<2x8x32xf32>
    %44 = vector.extract_strided_slice %38 {offsets = [0, 0, 0], sizes = [2, 8, 8], strides = [1, 1, 1]} : vector<2x8x32xf32> to vector<2x8x8xf32>
    %45 = vector.extract_strided_slice %42 {offsets = [0, 0, 0], sizes = [2, 8, 8], strides = [1, 1, 1]} : vector<2x8x32xf32> to vector<2x8x8xf32>
    "tpu.trace_start"() <{level = 10 : i32, message = "btd,bsd->bts"}> : () -> ()
    %cst_28 = arith.constant dense<0.000000e+00> : vector<2x8x8xf32>
    %46 = tpu.matmul %44, %45, %cst_28 {dimension_numbers = #tpu.dot_dimension_numbers<[2], [2], [1], [1], [0, 0, 0, 1, 1, 1], [0], [0]>} : vector<2x8x8xf32>, vector<2x8x8xf32>, vector<2x8x8xf32> -> vector<2x8x8xf32>
    "tpu.trace_stop"() : () -> ()
    %47 = vector.extract_strided_slice %41 {offsets = [0, 0], sizes = [16, 8], strides = [1, 1]} : vector<16x32xf32> to vector<16x8xf32>
    %48 = vector.extract_strided_slice %34 {offsets = [0, 0], sizes = [8, 8], strides = [1, 1]} : vector<8x32xf32> to vector<8x8xf32>
    "tpu.trace_start"() <{level = 10 : i32, message = "td,sd->ts"}> : () -> ()
    %cst_29 = arith.constant dense<0.000000e+00> : vector<16x8xf32>
    %49 = tpu.matmul %47, %48, %cst_29 {dimension_numbers = #tpu.dot_dimension_numbers<[1], [1], [0], [0], [0, 0, 1, 0], [], []>} : vector<16x8xf32>, vector<8x8xf32>, vector<16x8xf32> -> vector<16x8xf32>
    "tpu.trace_stop"() : () -> ()
    %50 = vector.shape_cast %49 : vector<16x8xf32> to vector<2x8x8xf32>
    %51 = arith.addf %46, %50 : vector<2x8x8xf32>
    %cst_30 = arith.constant 0.353553385 : f32
    %52 = vector.broadcast %cst_30 : f32 to vector<2x8x8xf32>
    %53 = arith.mulf %51, %52 : vector<2x8x8xf32>
    %54 = vector.broadcast %7 : vector<2x1x8xf32> to vector<2x8x8xf32>
    %55 = arith.addf %53, %54 : vector<2x8x8xf32>
    %cst_31 = arith.constant dense<0xFF800000> : vector<2x8xf32>
    %56 = vector.multi_reduction <maximumf>, %55, %cst_31 [2] : vector<2x8x8xf32> to vector<2x8xf32>
    %57 = vector.shape_cast %56 : vector<2x8xf32> to vector<2x8x1xf32>
    %58 = vector.broadcast %57 : vector<2x8x1xf32> to vector<2x8x8xf32>
    %59 = arith.subf %55, %58 : vector<2x8x8xf32>
    %60 = math.exp %59 : vector<2x8x8xf32>
    %cst_32 = arith.constant dense<0.000000e+00> : vector<2x8xf32>
    %61 = vector.multi_reduction <add>, %60, %cst_32 [2] : vector<2x8x8xf32> to vector<2x8xf32>
    %62 = vector.shape_cast %61 : vector<2x8xf32> to vector<2x8x1xf32>
    %63 = tpu.reciprocal %62 {approx = true} : vector<2x8x1xf32> -> vector<2x8x1xf32>
    %64 = vector.broadcast %63 : vector<2x8x1xf32> to vector<2x8x8xf32>
    %65 = arith.mulf %60, %64 : vector<2x8x8xf32>
    %66 = vector.broadcast %2 : vector<2x1x8xf32> to vector<2x8x8xf32>
    %67 = arith.mulf %65, %66 : vector<2x8x8xf32>
    %68 = vector.extract_strided_slice %43 {offsets = [0, 0, 0], sizes = [2, 8, 8], strides = [1, 1, 1]} : vector<2x8x32xf32> to vector<2x8x8xf32>
    "tpu.trace_start"() <{level = 10 : i32, message = "bts,bsd->btd"}> : () -> ()
    %cst_33 = arith.constant dense<0.000000e+00> : vector<2x8x8xf32>
    %69 = tpu.matmul %67, %68, %cst_33 {dimension_numbers = #tpu.dot_dimension_numbers<[2], [1], [1], [2], [0, 0, 0, 1, 1, 2], [0], [0]>} : vector<2x8x8xf32>, vector<2x8x8xf32>, vector<2x8x8xf32> -> vector<2x8x8xf32>
    "tpu.trace_stop"() : () -> ()
    %70 = vector.extract_strided_slice %38 {offsets = [0, 0, 8], sizes = [2, 8, 8], strides = [1, 1, 1]} : vector<2x8x32xf32> to vector<2x8x8xf32>
    %71 = vector.extract_strided_slice %42 {offsets = [0, 0, 8], sizes = [2, 8, 8], strides = [1, 1, 1]} : vector<2x8x32xf32> to vector<2x8x8xf32>
    "tpu.trace_start"() <{level = 10 : i32, message = "btd,bsd->bts"}> : () -> ()
    %cst_34 = arith.constant dense<0.000000e+00> : vector<2x8x8xf32>
    %72 = tpu.matmul %70, %71, %cst_34 {dimension_numbers = #tpu.dot_dimension_numbers<[2], [2], [1], [1], [0, 0, 0, 1, 1, 1], [0], [0]>} : vector<2x8x8xf32>, vector<2x8x8xf32>, vector<2x8x8xf32> -> vector<2x8x8xf32>
    "tpu.trace_stop"() : () -> ()
    %73 = vector.extract_strided_slice %41 {offsets = [0, 8], sizes = [16, 8], strides = [1, 1]} : vector<16x32xf32> to vector<16x8xf32>
    %74 = vector.extract_strided_slice %34 {offsets = [0, 8], sizes = [8, 8], strides = [1, 1]} : vector<8x32xf32> to vector<8x8xf32>
    "tpu.trace_start"() <{level = 10 : i32, message = "td,sd->ts"}> : () -> ()
    %cst_35 = arith.constant dense<0.000000e+00> : vector<16x8xf32>
    %75 = tpu.matmul %73, %74, %cst_35 {dimension_numbers = #tpu.dot_dimension_numbers<[1], [1], [0], [0], [0, 0, 1, 0], [], []>} : vector<16x8xf32>, vector<8x8xf32>, vector<16x8xf32> -> vector<16x8xf32>
    "tpu.trace_stop"() : () -> ()
    %76 = vector.shape_cast %75 : vector<16x8xf32> to vector<2x8x8xf32>
    %77 = arith.addf %72, %76 : vector<2x8x8xf32>
    %cst_36 = arith.constant 0.353553385 : f32
    %78 = vector.broadcast %cst_36 : f32 to vector<2x8x8xf32>
    %79 = arith.mulf %77, %78 : vector<2x8x8xf32>
    %80 = vector.broadcast %7 : vector<2x1x8xf32> to vector<2x8x8xf32>
    %81 = arith.addf %79, %80 : vector<2x8x8xf32>
    %cst_37 = arith.constant dense<0xFF800000> : vector<2x8xf32>
    %82 = vector.multi_reduction <maximumf>, %81, %cst_37 [2] : vector<2x8x8xf32> to vector<2x8xf32>
    %83 = vector.shape_cast %82 : vector<2x8xf32> to vector<2x8x1xf32>
    %84 = vector.broadcast %83 : vector<2x8x1xf32> to vector<2x8x8xf32>
    %85 = arith.subf %81, %84 : vector<2x8x8xf32>
    %86 = math.exp %85 : vector<2x8x8xf32>
    %cst_38 = arith.constant dense<0.000000e+00> : vector<2x8xf32>
    %87 = vector.multi_reduction <add>, %86, %cst_38 [2] : vector<2x8x8xf32> to vector<2x8xf32>
    %88 = vector.shape_cast %87 : vector<2x8xf32> to vector<2x8x1xf32>
    %89 = tpu.reciprocal %88 {approx = true} : vector<2x8x1xf32> -> vector<2x8x1xf32>
    %90 = vector.broadcast %89 : vector<2x8x1xf32> to vector<2x8x8xf32>
    %91 = arith.mulf %86, %90 : vector<2x8x8xf32>
    %92 = vector.broadcast %2 : vector<2x1x8xf32> to vector<2x8x8xf32>
    %93 = arith.mulf %91, %92 : vector<2x8x8xf32>
    %94 = vector.extract_strided_slice %43 {offsets = [0, 0, 8], sizes = [2, 8, 8], strides = [1, 1, 1]} : vector<2x8x32xf32> to vector<2x8x8xf32>
    "tpu.trace_start"() <{level = 10 : i32, message = "bts,bsd->btd"}> : () -> ()
    %cst_39 = arith.constant dense<0.000000e+00> : vector<2x8x8xf32>
    %95 = tpu.matmul %93, %94, %cst_39 {dimension_numbers = #tpu.dot_dimension_numbers<[2], [1], [1], [2], [0, 0, 0, 1, 1, 2], [0], [0]>} : vector<2x8x8xf32>, vector<2x8x8xf32>, vector<2x8x8xf32> -> vector<2x8x8xf32>
    "tpu.trace_stop"() : () -> ()
    %96 = vector.extract_strided_slice %38 {offsets = [0, 0, 16], sizes = [2, 8, 8], strides = [1, 1, 1]} : vector<2x8x32xf32> to vector<2x8x8xf32>
    %97 = vector.extract_strided_slice %42 {offsets = [0, 0, 16], sizes = [2, 8, 8], strides = [1, 1, 1]} : vector<2x8x32xf32> to vector<2x8x8xf32>
    "tpu.trace_start"() <{level = 10 : i32, message = "btd,bsd->bts"}> : () -> ()
    %cst_40 = arith.constant dense<0.000000e+00> : vector<2x8x8xf32>
    %98 = tpu.matmul %96, %97, %cst_40 {dimension_numbers = #tpu.dot_dimension_numbers<[2], [2], [1], [1], [0, 0, 0, 1, 1, 1], [0], [0]>} : vector<2x8x8xf32>, vector<2x8x8xf32>, vector<2x8x8xf32> -> vector<2x8x8xf32>
    "tpu.trace_stop"() : () -> ()
    %99 = vector.extract_strided_slice %41 {offsets = [0, 16], sizes = [16, 8], strides = [1, 1]} : vector<16x32xf32> to vector<16x8xf32>
    %100 = vector.extract_strided_slice %34 {offsets = [0, 16], sizes = [8, 8], strides = [1, 1]} : vector<8x32xf32> to vector<8x8xf32>
    "tpu.trace_start"() <{level = 10 : i32, message = "td,sd->ts"}> : () -> ()
    %cst_41 = arith.constant dense<0.000000e+00> : vector<16x8xf32>
    %101 = tpu.matmul %99, %100, %cst_41 {dimension_numbers = #tpu.dot_dimension_numbers<[1], [1], [0], [0], [0, 0, 1, 0], [], []>} : vector<16x8xf32>, vector<8x8xf32>, vector<16x8xf32> -> vector<16x8xf32>
    "tpu.trace_stop"() : () -> ()
    %102 = vector.shape_cast %101 : vector<16x8xf32> to vector<2x8x8xf32>
    %103 = arith.addf %98, %102 : vector<2x8x8xf32>
    %cst_42 = arith.constant 0.353553385 : f32
    %104 = vector.broadcast %cst_42 : f32 to vector<2x8x8xf32>
    %105 = arith.mulf %103, %104 : vector<2x8x8xf32>
    %106 = vector.broadcast %7 : vector<2x1x8xf32> to vector<2x8x8xf32>
    %107 = arith.addf %105, %106 : vector<2x8x8xf32>
    %cst_43 = arith.constant dense<0xFF800000> : vector<2x8xf32>
    %108 = vector.multi_reduction <maximumf>, %107, %cst_43 [2] : vector<2x8x8xf32> to vector<2x8xf32>
    %109 = vector.shape_cast %108 : vector<2x8xf32> to vector<2x8x1xf32>
    %110 = vector.broadcast %109 : vector<2x8x1xf32> to vector<2x8x8xf32>
    %111 = arith.subf %107, %110 : vector<2x8x8xf32>
    %112 = math.exp %111 : vector<2x8x8xf32>
    %cst_44 = arith.constant dense<0.000000e+00> : vector<2x8xf32>
    %113 = vector.multi_reduction <add>, %112, %cst_44 [2] : vector<2x8x8xf32> to vector<2x8xf32>
    %114 = vector.shape_cast %113 : vector<2x8xf32> to vector<2x8x1xf32>
    %115 = tpu.reciprocal %114 {approx = true} : vector<2x8x1xf32> -> vector<2x8x1xf32>
    %116 = vector.broadcast %115 : vector<2x8x1xf32> to vector<2x8x8xf32>
    %117 = arith.mulf %112, %116 : vector<2x8x8xf32>
    %118 = vector.broadcast %2 : vector<2x1x8xf32> to vector<2x8x8xf32>
    %119 = arith.mulf %117, %118 : vector<2x8x8xf32>
    %120 = vector.extract_strided_slice %43 {offsets = [0, 0, 16], sizes = [2, 8, 8], strides = [1, 1, 1]} : vector<2x8x32xf32> to vector<2x8x8xf32>
    "tpu.trace_start"() <{level = 10 : i32, message = "bts,bsd->btd"}> : () -> ()
    %cst_45 = arith.constant dense<0.000000e+00> : vector<2x8x8xf32>
    %121 = tpu.matmul %119, %120, %cst_45 {dimension_numbers = #tpu.dot_dimension_numbers<[2], [1], [1], [2], [0, 0, 0, 1, 1, 2], [0], [0]>} : vector<2x8x8xf32>, vector<2x8x8xf32>, vector<2x8x8xf32> -> vector<2x8x8xf32>
    "tpu.trace_stop"() : () -> ()
    %122 = vector.extract_strided_slice %38 {offsets = [0, 0, 24], sizes = [2, 8, 8], strides = [1, 1, 1]} : vector<2x8x32xf32> to vector<2x8x8xf32>
    %123 = vector.extract_strided_slice %42 {offsets = [0, 0, 24], sizes = [2, 8, 8], strides = [1, 1, 1]} : vector<2x8x32xf32> to vector<2x8x8xf32>
    "tpu.trace_start"() <{level = 10 : i32, message = "btd,bsd->bts"}> : () -> ()
    %cst_46 = arith.constant dense<0.000000e+00> : vector<2x8x8xf32>
    %124 = tpu.matmul %122, %123, %cst_46 {dimension_numbers = #tpu.dot_dimension_numbers<[2], [2], [1], [1], [0, 0, 0, 1, 1, 1], [0], [0]>} : vector<2x8x8xf32>, vector<2x8x8xf32>, vector<2x8x8xf32> -> vector<2x8x8xf32>
    "tpu.trace_stop"() : () -> ()
    %125 = vector.extract_strided_slice %41 {offsets = [0, 24], sizes = [16, 8], strides = [1, 1]} : vector<16x32xf32> to vector<16x8xf32>
    %126 = vector.extract_strided_slice %34 {offsets = [0, 24], sizes = [8, 8], strides = [1, 1]} : vector<8x32xf32> to vector<8x8xf32>
    "tpu.trace_start"() <{level = 10 : i32, message = "td,sd->ts"}> : () -> ()
    %cst_47 = arith.constant dense<0.000000e+00> : vector<16x8xf32>
    %127 = tpu.matmul %125, %126, %cst_47 {dimension_numbers = #tpu.dot_dimension_numbers<[1], [1], [0], [0], [0, 0, 1, 0], [], []>} : vector<16x8xf32>, vector<8x8xf32>, vector<16x8xf32> -> vector<16x8xf32>
    "tpu.trace_stop"() : () -> ()
    %128 = vector.shape_cast %127 : vector<16x8xf32> to vector<2x8x8xf32>
    %129 = arith.addf %124, %128 : vector<2x8x8xf32>
    %cst_48 = arith.constant 0.353553385 : f32
    %130 = vector.broadcast %cst_48 : f32 to vector<2x8x8xf32>
    %131 = arith.mulf %129, %130 : vector<2x8x8xf32>
    %132 = vector.broadcast %7 : vector<2x1x8xf32> to vector<2x8x8xf32>
    %133 = arith.addf %131, %132 : vector<2x8x8xf32>
    %cst_49 = arith.constant dense<0xFF800000> : vector<2x8xf32>
    %134 = vector.multi_reduction <maximumf>, %133, %cst_49 [2] : vector<2x8x8xf32> to vector<2x8xf32>
    %135 = vector.shape_cast %134 : vector<2x8xf32> to vector<2x8x1xf32>
    %136 = vector.broadcast %135 : vector<2x8x1xf32> to vector<2x8x8xf32>
    %137 = arith.subf %133, %136 : vector<2x8x8xf32>
    %138 = math.exp %137 : vector<2x8x8xf32>
    %cst_50 = arith.constant dense<0.000000e+00> : vector<2x8xf32>
    %139 = vector.multi_reduction <add>, %138, %cst_50 [2] : vector<2x8x8xf32> to vector<2x8xf32>
    %140 = vector.shape_cast %139 : vector<2x8xf32> to vector<2x8x1xf32>
    %141 = tpu.reciprocal %140 {approx = true} : vector<2x8x1xf32> -> vector<2x8x1xf32>
    %142 = vector.broadcast %141 : vector<2x8x1xf32> to vector<2x8x8xf32>
    %143 = arith.mulf %138, %142 : vector<2x8x8xf32>
    %144 = vector.broadcast %2 : vector<2x1x8xf32> to vector<2x8x8xf32>
    %145 = arith.mulf %143, %144 : vector<2x8x8xf32>
    %146 = vector.extract_strided_slice %43 {offsets = [0, 0, 24], sizes = [2, 8, 8], strides = [1, 1, 1]} : vector<2x8x32xf32> to vector<2x8x8xf32>
    "tpu.trace_start"() <{level = 10 : i32, message = "bts,bsd->btd"}> : () -> ()
    %cst_51 = arith.constant dense<0.000000e+00> : vector<2x8x8xf32>
    %147 = tpu.matmul %145, %146, %cst_51 {dimension_numbers = #tpu.dot_dimension_numbers<[2], [1], [1], [2], [0, 0, 0, 1, 1, 2], [0], [0]>} : vector<2x8x8xf32>, vector<2x8x8xf32>, vector<2x8x8xf32> -> vector<2x8x8xf32>
    "tpu.trace_stop"() : () -> ()
    %148 = tpu.concatenate %69, %95, %121, %147 in 2 : vector<2x8x8xf32>, vector<2x8x8xf32>, vector<2x8x8xf32>, vector<2x8x8xf32> -> vector<2x8x32xf32>
    %149 = vector.shape_cast %148 : vector<2x8x32xf32> to vector<16x32xf32>
    %c0_52 = arith.constant 0 : index
    %c256_53 = arith.constant 256 : index
    %150 = vector.load %arg4[%c0_52, %c256_53] : memref<32x896xf32, #tpu.memory_space<vmem>>, vector<32x32xf32>
    %cst_54 = arith.constant dense<0.000000e+00> : vector<16x32xf32>
    %151 = tpu.matmul %149, %150, %cst_54 {dimension_numbers = #tpu.dot_dimension_numbers<[1], [0], [0], [1], [0, 0, 1, 1], [], []>} : vector<16x32xf32>, vector<32x32xf32>, vector<16x32xf32> -> vector<16x32xf32>
    %152 = arith.addf %24, %151 : vector<16x32xf32>
    %c0_55 = arith.constant 0 : index
    %c640 = arith.constant 640 : index
    %153 = vector.load %arg6[%c0_55, %c640] : memref<1x1408xf32, #tpu.memory_space<vmem>>, vector<1x32xf32>
    %154 = vector.broadcast %153 : vector<1x32xf32> to vector<16x32xf32>
    %155 = arith.addf %152, %154 : vector<16x32xf32>
    %156 = vector.broadcast %3 : vector<16x1xf32> to vector<16x32xf32>
    %157 = arith.mulf %155, %156 : vector<16x32xf32>
    %c0_56 = arith.constant 0 : index
    %c512_57 = arith.constant 512 : index
    %158 = vector.load %arg4[%c0_56, %c512_57] : memref<32x896xf32, #tpu.memory_space<vmem>>, vector<32x64xf32>
    %cst_58 = arith.constant dense<0.000000e+00> : vector<16x64xf32>
    %159 = tpu.matmul %157, %158, %cst_58 {dimension_numbers = #tpu.dot_dimension_numbers<[1], [0], [0], [1], [0, 0, 1, 1], [], []>} : vector<16x32xf32>, vector<32x64xf32>, vector<16x64xf32> -> vector<16x64xf32>
    %c0_59 = arith.constant 0 : index
    %c768 = arith.constant 768 : index
    %160 = vector.load %arg6[%c0_59, %c768] : memref<1x1408xf32, #tpu.memory_space<vmem>>, vector<1x64xf32>
    %161 = vector.broadcast %160 : vector<1x64xf32> to vector<16x64xf32>
    %162 = arith.addf %159, %161 : vector<16x64xf32>
    %163 = vector.extract_strided_slice %162 {offsets = [0, 0], sizes = [16, 32], strides = [1, 1]} : vector<16x64xf32> to vector<16x32xf32>
    %164 = vector.extract_strided_slice %162 {offsets = [0, 32], sizes = [16, 32], strides = [1, 1]} : vector<16x64xf32> to vector<16x32xf32>
    %165 = arith.negf %164 : vector<16x32xf32>
    %166 = math.exp %165 : vector<16x32xf32>
    %cst_60 = arith.constant 1.000000e+00 : f32
    %167 = vector.broadcast %cst_60 : f32 to vector<16x32xf32>
    %168 = arith.addf %167, %166 : vector<16x32xf32>
    %169 = arith.divf %167, %168 : vector<16x32xf32>
    %170 = arith.mulf %163, %169 : vector<16x32xf32>
    %171 = vector.shape_cast %170 : vector<16x32xf32> to vector<2x8x32xf32>
    %cst_61 = arith.constant 0.000000e+00 : f32
    %172 = vector.broadcast %cst_61 : f32 to vector<2x3x32xf32>
    %173 = tpu.concatenate %172, %171, %172 in 1 : vector<2x3x32xf32>, vector<2x8x32xf32>, vector<2x3x32xf32> -> vector<2x14x32xf32>
    %c0_62 = arith.constant 0 : index
    %c0_63 = arith.constant 0 : index
    %c0_64 = arith.constant 0 : index
    %174 = vector.load %arg7[%c0_62, %c0_63, %c0_64] : memref<7x1x32xf32, #tpu.memory_space<vmem>>, vector<7x1x32xf32>
    %cst_65 = arith.constant 0.000000e+00 : f32
    %175 = vector.broadcast %cst_65 : f32 to vector<2x8x32xf32>
    %176 = vector.extract_strided_slice %173 {offsets = [0, 0, 0], sizes = [2, 8, 32], strides = [1, 1, 1]} : vector<2x14x32xf32> to vector<2x8x32xf32>
    %177 = vector.extract_strided_slice %174 {offsets = [0, 0, 0], sizes = [1, 1, 32], strides = [1, 1, 1]} : vector<7x1x32xf32> to vector<1x1x32xf32>
    %178 = vector.shape_cast %177 : vector<1x1x32xf32> to vector<1x32xf32>
    %179 = vector.shape_cast %178 : vector<1x32xf32> to vector<1x1x32xf32>
    %180 = vector.broadcast %179 : vector<1x1x32xf32> to vector<2x8x32xf32>
    %181 = arith.mulf %176, %180 : vector<2x8x32xf32>
    %182 = arith.addf %175, %181 : vector<2x8x32xf32>
    %183 = vector.extract_strided_slice %173 {offsets = [0, 1, 0], sizes = [2, 8, 32], strides = [1, 1, 1]} : vector<2x14x32xf32> to vector<2x8x32xf32>
    %184 = vector.extract_strided_slice %174 {offsets = [1, 0, 0], sizes = [1, 1, 32], strides = [1, 1, 1]} : vector<7x1x32xf32> to vector<1x1x32xf32>
    %185 = vector.shape_cast %184 : vector<1x1x32xf32> to vector<1x32xf32>
    %186 = vector.shape_cast %185 : vector<1x32xf32> to vector<1x1x32xf32>
    %187 = vector.broadcast %186 : vector<1x1x32xf32> to vector<2x8x32xf32>
    %188 = arith.mulf %183, %187 : vector<2x8x32xf32>
    %189 = arith.addf %182, %188 : vector<2x8x32xf32>
    %190 = vector.extract_strided_slice %173 {offsets = [0, 2, 0], sizes = [2, 8, 32], strides = [1, 1, 1]} : vector<2x14x32xf32> to vector<2x8x32xf32>
    %191 = vector.extract_strided_slice %174 {offsets = [2, 0, 0], sizes = [1, 1, 32], strides = [1, 1, 1]} : vector<7x1x32xf32> to vector<1x1x32xf32>
    %192 = vector.shape_cast %191 : vector<1x1x32xf32> to vector<1x32xf32>
    %193 = vector.shape_cast %192 : vector<1x32xf32> to vector<1x1x32xf32>
    %194 = vector.broadcast %193 : vector<1x1x32xf32> to vector<2x8x32xf32>
    %195 = arith.mulf %190, %194 : vector<2x8x32xf32>
    %196 = arith.addf %189, %195 : vector<2x8x32xf32>
    %197 = vector.extract_strided_slice %173 {offsets = [0, 3, 0], sizes = [2, 8, 32], strides = [1, 1, 1]} : vector<2x14x32xf32> to vector<2x8x32xf32>
    %198 = vector.extract_strided_slice %174 {offsets = [3, 0, 0], sizes = [1, 1, 32], strides = [1, 1, 1]} : vector<7x1x32xf32> to vector<1x1x32xf32>
    %199 = vector.shape_cast %198 : vector<1x1x32xf32> to vector<1x32xf32>
    %200 = vector.shape_cast %199 : vector<1x32xf32> to vector<1x1x32xf32>
    %201 = vector.broadcast %200 : vector<1x1x32xf32> to vector<2x8x32xf32>
    %202 = arith.mulf %197, %201 : vector<2x8x32xf32>
    %203 = arith.addf %196, %202 : vector<2x8x32xf32>
    %204 = vector.extract_strided_slice %173 {offsets = [0, 4, 0], sizes = [2, 8, 32], strides = [1, 1, 1]} : vector<2x14x32xf32> to vector<2x8x32xf32>
    %205 = vector.extract_strided_slice %174 {offsets = [4, 0, 0], sizes = [1, 1, 32], strides = [1, 1, 1]} : vector<7x1x32xf32> to vector<1x1x32xf32>
    %206 = vector.shape_cast %205 : vector<1x1x32xf32> to vector<1x32xf32>
    %207 = vector.shape_cast %206 : vector<1x32xf32> to vector<1x1x32xf32>
    %208 = vector.broadcast %207 : vector<1x1x32xf32> to vector<2x8x32xf32>
    %209 = arith.mulf %204, %208 : vector<2x8x32xf32>
    %210 = arith.addf %203, %209 : vector<2x8x32xf32>
    %211 = vector.extract_strided_slice %173 {offsets = [0, 5, 0], sizes = [2, 8, 32], strides = [1, 1, 1]} : vector<2x14x32xf32> to vector<2x8x32xf32>
    %212 = vector.extract_strided_slice %174 {offsets = [5, 0, 0], sizes = [1, 1, 32], strides = [1, 1, 1]} : vector<7x1x32xf32> to vector<1x1x32xf32>
    %213 = vector.shape_cast %212 : vector<1x1x32xf32> to vector<1x32xf32>
    %214 = vector.shape_cast %213 : vector<1x32xf32> to vector<1x1x32xf32>
    %215 = vector.broadcast %214 : vector<1x1x32xf32> to vector<2x8x32xf32>
    %216 = arith.mulf %211, %215 : vector<2x8x32xf32>
    %217 = arith.addf %210, %216 : vector<2x8x32xf32>
    %218 = vector.extract_strided_slice %173 {offsets = [0, 6, 0], sizes = [2, 8, 32], strides = [1, 1, 1]} : vector<2x14x32xf32> to vector<2x8x32xf32>
    %219 = vector.extract_strided_slice %174 {offsets = [6, 0, 0], sizes = [1, 1, 32], strides = [1, 1, 1]} : vector<7x1x32xf32> to vector<1x1x32xf32>
    %220 = vector.shape_cast %219 : vector<1x1x32xf32> to vector<1x32xf32>
    %221 = vector.shape_cast %220 : vector<1x32xf32> to vector<1x1x32xf32>
    %222 = vector.broadcast %221 : vector<1x1x32xf32> to vector<2x8x32xf32>
    %223 = arith.mulf %218, %222 : vector<2x8x32xf32>
    %224 = arith.addf %217, %223 : vector<2x8x32xf32>
    %225 = vector.shape_cast %224 : vector<2x8x32xf32> to vector<16x32xf32>
    %c0_66 = arith.constant 0 : index
    %c896 = arith.constant 896 : index
    %226 = vector.load %arg6[%c0_66, %c896] : memref<1x1408xf32, #tpu.memory_space<vmem>>, vector<1x32xf32>
    %227 = vector.broadcast %226 : vector<1x32xf32> to vector<16x32xf32>
    %228 = arith.addf %225, %227 : vector<16x32xf32>
    %229 = arith.negf %228 : vector<16x32xf32>
    %230 = math.exp %229 : vector<16x32xf32>
    %cst_67 = arith.constant 1.000000e+00 : f32
    %231 = vector.broadcast %cst_67 : f32 to vector<16x32xf32>
    %232 = arith.addf %231, %230 : vector<16x32xf32>
    %233 = arith.divf %231, %232 : vector<16x32xf32>
    %234 = arith.mulf %228, %233 : vector<16x32xf32>
    %c0_68 = arith.constant 0 : index
    %c640_69 = arith.constant 640 : index
    %235 = vector.load %arg4[%c0_68, %c640_69] : memref<32x896xf32, #tpu.memory_space<vmem>>, vector<32x32xf32>
    %cst_70 = arith.constant dense<0.000000e+00> : vector<16x32xf32>
    %236 = tpu.matmul %234, %235, %cst_70 {dimension_numbers = #tpu.dot_dimension_numbers<[1], [0], [0], [1], [0, 0, 1, 1], [], []>} : vector<16x32xf32>, vector<32x32xf32>, vector<16x32xf32> -> vector<16x32xf32>
    %c0_71 = arith.constant 0 : index
    %c1024 = arith.constant 1024 : index
    %237 = vector.load %arg6[%c0_71, %c1024] : memref<1x1408xf32, #tpu.memory_space<vmem>>, vector<1x32xf32>
    %238 = vector.broadcast %237 : vector<1x32xf32> to vector<16x32xf32>
    %239 = arith.addf %236, %238 : vector<16x32xf32>
    %240 = vector.broadcast %3 : vector<16x1xf32> to vector<16x32xf32>
    %241 = arith.mulf %239, %240 : vector<16x32xf32>
    %242 = arith.addf %155, %241 : vector<16x32xf32>
    %c0_72 = arith.constant 0 : index
    %c768_73 = arith.constant 768 : index
    %243 = vector.load %arg4[%c0_72, %c768_73] : memref<32x896xf32, #tpu.memory_space<vmem>>, vector<32x64xf32>
    %cst_74 = arith.constant dense<0.000000e+00> : vector<16x64xf32>
    %244 = tpu.matmul %242, %243, %cst_74 {dimension_numbers = #tpu.dot_dimension_numbers<[1], [0], [0], [1], [0, 0, 1, 1], [], []>} : vector<16x32xf32>, vector<32x64xf32>, vector<16x64xf32> -> vector<16x64xf32>
    %c0_75 = arith.constant 0 : index
    %c1152 = arith.constant 1152 : index
    %245 = vector.load %arg6[%c0_75, %c1152] : memref<1x1408xf32, #tpu.memory_space<vmem>>, vector<1x64xf32>
    %246 = vector.broadcast %245 : vector<1x64xf32> to vector<16x64xf32>
    %247 = arith.addf %244, %246 : vector<16x64xf32>
    %248 = arith.negf %247 : vector<16x64xf32>
    %249 = math.exp %248 : vector<16x64xf32>
    %cst_76 = arith.constant 1.000000e+00 : f32
    %250 = vector.broadcast %cst_76 : f32 to vector<16x64xf32>
    %251 = arith.addf %250, %249 : vector<16x64xf32>
    %252 = arith.divf %250, %251 : vector<16x64xf32>
    %253 = arith.mulf %247, %252 : vector<16x64xf32>
    %c0_77 = arith.constant 0 : index
    %c128_78 = arith.constant 128 : index
    %254 = vector.load %arg5[%c0_77, %c128_78] : memref<64x256xf32, #tpu.memory_space<vmem>>, vector<64x32xf32>
    %cst_79 = arith.constant dense<0.000000e+00> : vector<16x32xf32>
    %255 = tpu.matmul %253, %254, %cst_79 {dimension_numbers = #tpu.dot_dimension_numbers<[1], [0], [0], [1], [0, 0, 1, 1], [], []>} : vector<16x64xf32>, vector<64x32xf32>, vector<16x32xf32> -> vector<16x32xf32>
    %256 = arith.addf %242, %255 : vector<16x32xf32>
    %c0_80 = arith.constant 0 : index
    %c1280 = arith.constant 1280 : index
    %257 = vector.load %arg6[%c0_80, %c1280] : memref<1x1408xf32, #tpu.memory_space<vmem>>, vector<1x32xf32>
    %258 = vector.broadcast %257 : vector<1x32xf32> to vector<16x32xf32>
    %259 = arith.addf %256, %258 : vector<16x32xf32>
    %260 = arith.mulf %259, %259 : vector<16x32xf32>
    %cst_81 = arith.constant dense<0.000000e+00> : vector<16xf32>
    %261 = vector.multi_reduction <add>, %260, %cst_81 [1] : vector<16x32xf32> to vector<16xf32>
    %262 = vector.shape_cast %261 : vector<16xf32> to vector<16x1xf32>
    %cst_82 = arith.constant 3.200000e+01 : f32
    %263 = vector.broadcast %cst_82 : f32 to vector<16x1xf32>
    %264 = arith.divf %262, %263 : vector<16x1xf32>
    %c0_83 = arith.constant 0 : index
    %c0_84 = arith.constant 0 : index
    %265 = memref.load %arg8[%c0_83, %c0_84] : memref<1x1xf32, #tpu.memory_space<smem>>
    %266 = vector.broadcast %265 : f32 to vector<16x1xf32>
    %267 = arith.addf %264, %266 : vector<16x1xf32>
    %268 = math.rsqrt %267 : vector<16x1xf32>
    %269 = vector.broadcast %268 : vector<16x1xf32> to vector<16x32xf32>
    %270 = arith.mulf %259, %269 : vector<16x32xf32>
    %c0_85 = arith.constant 0 : index
    %c0_86 = arith.constant 0 : index
    %271 = vector.load %arg9[%c0_85, %c0_86] : memref<16x32xf32, #tpu.memory_space<vmem>>, vector<16x32xf32>
    tpu.vector_store %arg9[%c0_85, %c0_86], %270 {strides = array<i32>} : memref<16x32xf32, #tpu.memory_space<vmem>>, vector<16x32xf32>,
    return
  }
}

</mosaic_0001>

<bundles_post_ra>
// kernel: tpu_custom_call.1
= control target key start
LH: loop header
LB: loop body
LE: loop exit
PB: predicated region body
PF: predicated region fallthrough
CT: control target
= control target key end

     0   :  { %15 = vsyncpa [#allocation4], 0  ;;  %s4072_s0 = inlined_call_operand.vmem [shape: f32[16,32], index: 0, kind: input, shape index: {}]   ;;  %s4073_s1 = inlined_call_operand.hbm [shape: f32[8,32], index: 1, kind: input, shape index: {}]   ;;  %s4074_s2 = inlined_call_operand.hbm [shape: f32[2,1,8], index: 2, kind: input, shape index: {}]   ;;  %s4075_s3 = inlined_call_operand.vmem [shape: f32[16,1], index: 3, kind: input, shape index: {}]   ;;  %s4076_s4 = inlined_call_operand.hbm [shape: f32[32,896], index: 4, kind: input, shape index: {}]   ;;  %s4077_s5 = inlined_call_operand.hbm [shape: f32[64,256], index: 5, kind: input, shape index: {}]   ;;  %s4078_s6 = inlined_call_operand.vmem [shape: f32[1,1408], index: 6, kind: input, shape index: {}]   ;;  %s4079_s7 = inlined_call_operand.hbm [shape: f32[7,1,32], index: 7, kind: input, shape index: {}]   ;;  %s4080_s8 = inlined_call_operand.<no memory space> [shape: f32[1,1], index: 8, kind: input, shape index: {}]   ;;  %s4081_s9 = inlined_call_operand.hbm [shape: f32[16,32], index: 9, kind: output, shape index: {}]  }
   0x1   :  { %16 = vsyncpa [#allocation7], 0 }
   0x2   :  { %17 = vsyncpa [#allocation10], 0 }
   0x3   :  { %18 = vsyncpa [#allocation5], 0  ;;  %s3640_s30 = smov [#allocation6]  }
   0x4   :  { %s36_s10 = sshll.u32 %s3640_s30, 4  ;;  %s37_s10 = int_to_ptr.vmem [resolvable:$true] %s36_s10 }
   0x5   :  { %s3520_s11 = scalar_lea.vmem %s37_s10, 32  ;;  %p3525_p1 = scmp.lt.s32.totalorder %s37_s10, %s37_s10 }
   0x6   :  { %p3521_p0 = scmp.ne.s32.totalorder %s37_s10, %s3520_s11  ;;  %p3526_p2 = scmp.lt.s32.totalorder %s3520_s11, %s3520_s11 }
   0x8   :  { %p3527_p3 = por %p3526_p2, %p3525_p1 }
   0xa   :  { %p3528_p4 = pnand %p3527_p3, %p3521_p0 }
   0xc   :  { %3531 = shalt.err (!%p3528_p4)
}
   0xd   :  { %s3641_s12 = smov 16   ;;  %s3642_s13 = smov 1  }
   0xe   :  { %42 = dma.hbm_to_vmem [thread:$0]  %s4074_s2, 32, %s37_s10, [#allocation7], %s3641_s12, %s3641_s12, %s3642_s13  }
   0xf   :  { %s3643_s16 = smov [#allocation9]  }
  0x10   :  { %s62_s17 = sshll.u32 %s3643_s16, 4  ;;  %s63_s17 = int_to_ptr.vmem [resolvable:$true] %s62_s17 }
  0x11   :  { %s3540_s18 = scalar_lea.vmem %s63_s17, 2048  ;;  %p3545_p6 = scmp.lt.s32.totalorder %s63_s17, %s63_s17 }
  0x12   :  { %p3541_p5 = scmp.ne.s32.totalorder %s63_s17, %s3540_s18  ;;  %p3546_p7 = scmp.lt.s32.totalorder %s3540_s18, %s3540_s18 }
  0x14   :  { %p3547_p8 = por %p3546_p7, %p3545_p6 }
  0x16   :  { %p3548_p9 = pnand %p3547_p8, %p3541_p5 }
  0x18   :  { %3551 = shalt.err (!%p3548_p9)
}
  0x19   :  { %s3644_s19 = smov 256   ;;  %s3645_s22 = smov [#allocation3]  }
  0x1a   :  { %68 = dma.hbm_to_vmem [thread:$0]  %s4077_s5, 2048, %s63_s17, [#allocation10], %s3644_s19, %s3644_s19, %s3641_s12  }
  0x1b   :  { %s27_s23 = sshll.u32 %s3645_s22, 4  ;;  %s3646_s2 = smov [#allocation8]   ;;  %s28_s23 = int_to_ptr.vmem [resolvable:$true] %s27_s23 }
  0x1c   :  { %s50_s24 = sshll.u32 %s3646_s2, 4  ;;  %s3560_s25 = scalar_lea.vmem %s28_s23, 128  ;;  %s51_s24 = int_to_ptr.vmem [resolvable:$true] %s50_s24 }
  0x1d   :  { %p3561_p10 = scmp.ne.s32.totalorder %s28_s23, %s3560_s25  ;;  %p3565_p11 = scmp.lt.s32.totalorder %s28_s23, %s28_s23 }
  0x1e   :  { %p3566_p12 = scmp.lt.s32.totalorder %s3560_s25, %s3560_s25 }
  0x20   :  { %p3567_p13 = por %p3566_p12, %p3565_p11 }
  0x22   :  { %p3568_p0 = pnand %p3567_p13, %p3561_p10 }
  0x24   :  { %3571 = shalt.err (!%p3568_p0)
}
  0x25   :  { %30 = dma.hbm_to_vmem [thread:$0]  %s4073_s1, 128, %s28_s23, [#allocation4]  }
  0x26   :  { %s3580_s28 = scalar_lea.vmem %s51_s24, 3584  ;;  %p3585_p2 = scmp.lt.s32.totalorder %s51_s24, %s51_s24 }
  0x27   :  { %p3581_p1 = scmp.ne.s32.totalorder %s51_s24, %s3580_s28  ;;  %p3586_p3 = scmp.lt.s32.totalorder %s3580_s28, %s3580_s28 }
  0x29   :  { %p3587_p4 = por %p3586_p3, %p3585_p2 }
  0x2b   :  { %p3588_p5 = pnand %p3587_p4, %p3581_p1 }
  0x2d   :  { %3591 = shalt.err (!%p3588_p5)
}
  0x2e   :  { %s3647_s5 = smov 896   ;;  %s3648_s29 = smov 56  }
  0x2f   :  { %56 = dma.hbm_to_vmem [thread:$0]  %s4076_s4, 3584, %s51_s24, [#allocation7], %s3647_s5, %s3647_s5, %s3648_s29  }
  0x30   :  { %s3649_s11 = smov [#allocation11]  }
  0x31   :  { %s76_s14 = sshll.u32 %s3649_s11, 4  ;;  %s77_s14 = int_to_ptr.vmem [resolvable:$true] %s76_s14 }
  0x32   :  { %s3600_s15 = scalar_lea.vmem %s77_s14, 112  ;;  %s3604_s1 = scalar_lea.vmem %s77_s14, 128 }
  0x33   :  { %p3601_p6 = scmp.ne.s32.totalorder %s77_s14, %s3600_s15  ;;  %p3605_p7 = scmp.lt.s32.totalorder %s77_s14, %s77_s14 }
  0x34   :  { %p3606_p8 = scmp.lt.s32.totalorder %s3604_s1, %s3600_s15 }
  0x36   :  { %p3607_p9 = por %p3606_p8, %p3605_p7 }
  0x38   :  { %p3608_p10 = pnand %p3607_p9, %p3601_p6 }
  0x3a   :  { %3611 = shalt.err (!%p3608_p10)
}
  0x3b   :  { %82 = dma.hbm_to_vmem [thread:$0]  %s4079_s7, 112, %s77_s14, [#allocation10], %s3641_s12, %s3641_s12, %s3642_s13  }
  0x3c   :  { %3632 = dma.done.wait [#allocation4], 128  }
  0x3d   :  { %3633 = vsyncadd [#allocation4], 4294967168 }
  0x3e   :  { %3634 = dma.done.wait [#allocation7], 3616  }
  0x3f   :  { %3635 = vsyncadd [#allocation7], 4294963680 }
  0x40   :  { %3636 = dma.done.wait [#allocation10], 2160  }
  0x41   :  { %3637 = vsyncadd [#allocation10], 4294965136  ;;  %vm122_vm0 = vcmask 261120   ;;  %v114_v0 = vld [vmem:[#allocation8 + $0xc0] sm:$0xff]  ;;  %v113_v1 = vld [vmem:[#allocation8 + $0x88] sm:$0xff]  ;;  %vm226_vm1 = vcmask 523264   ;;  %v751_v61 = vlaneseq }
  0x42   :  { %3200 = vmatprep.subr.mxu1 %v114_v0  ;;  %v3743_v2 = vld [vmem:[%s4072_s0] sm:$0xff]  ;;  %v3750_v5 = vld [vmem:[%s4072_s0 + $0x8] sm:$0xff]  ;;  %v322_v14 = vld [vmem:[#allocation8 + $0xa8] sm:$0xff]  ;;  %v3650_v33 = vmov 0.0   ;;  %vm3651_vm2 = vmmov 0   ;;  %vm506_vm3 = vcmask 64512  }
  0x43   :  { %3201 = vmatpush3.msra.mxu1 %v114_v0  ;;  %v112_v3 = vld [vmem:[#allocation8 + $0x50] sm:$0xff]  ;;  %3208 = vmatprep.mubr.msk.f32.mxu1 %vm122_vm0, %v3743_v2  ;;  %v111_v4 = vld [vmem:[#allocation8 + $0x18] sm:$0xff]  ;;  %v224_v7 = vld [vmem:[#allocation9 + $0x60] sm:$0xff]  ;;  %s3652_s25 = smov 96   ;;  %v752_v62 = vshrl.u32 %v751_v61, 7  ;;  %s3653_s28 = smov 64  }
  0x44   :  { %3202 = vmatprep.subr.mxu1 %v113_v1  ;;  %v225_v6 = vld [vmem:[#allocation9 + $0x70] sm:$0xff]  ;;  %v222_v9 = vld [vmem:[#allocation9 + $0x40] sm:$0xff]  ;;  %3230 = vmatprep.subr.mxu0 %v322_v14  ;;  %v320_v31 = vld [vmem:[#allocation8 + $0x38] sm:$0xff]  ;;  %s3654_s5 = smov 88   ;;  %s3655_s30 = smov 120   ;;  %vm2246_vm4 = vcmask 130048  }
  0x45   :  { %3203 = vmatpush3.msra.mxu1 %v113_v1  ;;  %v223_v8 = vld [vmem:[#allocation9 + $0x50] sm:$0xff]  ;;  %v220_v11 = vld [vmem:[#allocation9 + $0x20] sm:$0xff]  ;;  %3231 = vmatpush3.msra.mxu0 %v322_v14  ;;  %v413_v42 = vld [vmem:[#allocation8 + $0x78] sm:$0xff]  ;;  %v753_v63 = vsub.s32 0, %v752_v62  ;;  %s3656_s10 = smov 112   ;;  %s3657_s11 = smov 80  }
  0x46   :  { %3204 = vmatprep.subr.mxu1 %v112_v3  ;;  %v221_v10 = vld [vmem:[#allocation9 + $0x30] sm:$0xff]  ;;  %v218_v13 = vld [vmem:[#allocation9] sm:$0xff]  ;;  %v411_v44 = vld [vmem:[#allocation8 + $0x8] sm:$0xff]  ;;  %s3659_s14 = smov 104   ;;  %s3660_s15 = smov 72   ;;  %vm2249_vm5 = vcmask 195584  }
  0x47   :  { %3205 = vmatpush3.msra.mxu1 %v112_v3  ;;  %v219_v12 = vld [vmem:[#allocation9 + $0x10] sm:$0xff]  ;;  %v319_v32 = vld [vmem:[#allocation8] sm:$0xff]  ;;  %v3024_v47 = vld [vmem:[%s4078_s6 + $0x2] ss:$0 sm:$0xff]  ;;  %s3661_s1 = smov 40   ;;  %s3662_s16 = smov 8  }
  0x48   :  { %3206 = vmatprep.subr.mxu1 %v111_v4  ;;  %v3016_v15 = vld [vmem:[%s4078_s6] ss:$0 sm:$0xff]  ;;  %v3023_v37 = vld [vmem:[%s4078_s6 + $0x1] ss:$0 sm:$0xff]  ;;  %v412_v43 = vld [vmem:[#allocation8 + $0x40] sm:$0xff]  ;;  %vm2480_vm6 = vcmask 1042432  }
  0x49   :  { %3207 = vmatpush3.msra.mxu1 %v111_v4  ;;  %v321_v30 = vld [vmem:[#allocation8 + $0x70] sm:$0xff]  ;;  %v3029_v50 = vld [vmem:[%s4078_s6 + $0x4] ss:$0 sm:$0xff]  ;;  %v3028_v57 = vld [vmem:[%s4078_s6 + $0x3] ss:$0 sm:$0xff]  ;;  %vm2516_vm7 = vcmask 1046528  }
  0x4a   :  { %3209 = vmatmul.mubr.msk.f32.vlgmr.msra.gmra.mxu1 %vm122_vm0, %v3750_v5  ;;  %3211 = vmatprep.subr.mxu1 %v225_v6  ;;  %v414_v41 = vld [vmem:[#allocation8 + $0xb0] sm:$0xff]  ;;  %v103_v0 = vld [vmem:[#allocation6] sm:$0x1]  ;;  %vm2541_vm8 = vcmask 1045504   ;;  %vm2566_vm9 = vcmask 1044480   ;;  %vm2591_vm10 = vcmask 1043456  }
  0x4b   :  { %3212 = vmatpush3.msra.mxu1 %v225_v6  ;;  %3232 = vmatprep.subr.mxu0 %v321_v30  ;;  %v102_v45 = vld [vmem:[#allocation3] sm:$0xff]  ;;  %v3836_v1 = vrot.slane %v103_v0, %v753_v63  ;;  %v107_v4 = vsub.f32 1.0, %v103_v0  ;;  %vm2640_vm11 = vcmask 1041408  }
  0x4c   :  { %3213 = vmatprep.subr.mxu1 %v224_v7  ;;  %3233 = vmatpush3.msra.mxu0 %v321_v30 }
  0x4d   :  { %3214 = vmatpush3.msra.mxu1 %v224_v7  ;;  %3234 = vmatprep.subr.mxu0 %v320_v31  ;;  %v109_v6 = vmul.f32 -1e+30, %v107_v4 }
  0x4e   :  { %3215 = vmatprep.subr.mxu1 %v223_v8  ;;  %3235 = vmatpush3.msra.mxu0 %v320_v31 }
  0x4f   :  { %3216 = vmatpush3.msra.mxu1 %v223_v8  ;;  %3236 = vmatprep.subr.mxu0 %v319_v32 }
  0x50   :  { %3217 = vmatprep.subr.mxu1 %v222_v9  ;;  %3237 = vmatpush3.msra.mxu0 %v319_v32 }
  0x51   :  { %3218 = vmatpush3.msra.mxu1 %v222_v9  ;;  %3241 = vmatprep.subr.mxu0 %v3650_v33 }
  0x52   :  { %3219 = vmatprep.subr.mxu1 %v221_v10 }
  0x53   :  { %3220 = vmatpush3.msra.mxu1 %v221_v10 }
  0x54   :  { %3221 = vmatprep.subr.mxu1 %v220_v11 }
  0x55   :  { %3222 = vmatpush3.msra.mxu1 %v220_v11  ;;  %v3840_v11 = vrot.slane %v109_v6, %v753_v63 }
  0x56   :  { %3223 = vmatprep.subr.mxu1 %v219_v12 }
  0x57   :  { %3224 = vmatpush3.msra.mxu1 %v219_v12 }
  0x58   :  { %3225 = vmatprep.subr.mxu1 %v218_v13 }
  0x59   :  { %3226 = vmatpush3.msra.mxu1 %v218_v13 }
 0x10a   :  { %v3210_v16 = vpop.f32.mrf.mxu1 }
 0x10b   :  { %v201_v17 = vadd.f32 %v3210_v16, %v3016_v15 }
 0x10c   :  { %v195_v18 = vpop.f32.mrf.mxu1 }
 0x10d   :  { %v3020_v19 = vmul.f32 -1.442695, %v201_v17  ;;  %v196_v20 = vadd.f32 %v3016_v15, %v195_v18 }
 0x10f   :  { %3444 = vpow2.f32 %v3020_v19  ;;  %v3019_v21 = vmul.f32 -1.442695, %v196_v20 }
 0x111   :  { %3446 = vpow2.f32 %v3019_v21 }
 0x11c   :  { %v3445_v22 = vpop.eup %3444 }
 0x11d   :  { %v211_v23 = vadd.f32 1.0, %v3445_v22 }
 0x11e   :  { %v3447_v24 = vpop.eup %3446 }
 0x11f   :  { %v210_v25 = vadd.f32 1.0, %v3447_v24  ;;  %3448 = vrcp.f32 %v211_v23 }
 0x121   :  { %3450 = vrcp.f32 %v210_v25 }
 0x12c   :  { %v3449_v26 = vpop.eup %3448 }
 0x12d   :  { %v217_v29 = vmul.f32 %v3449_v26, %v201_v17 }
 0x12e   :  { %v3451_v27 = vpop.eup %3450 }
 0x12f   :  { %v216_v28 = vmul.f32 %v3451_v27, %v196_v20 }
 0x131   :  { %3227 = vmatprep.mubr.msk.f32.mxu1 %vm226_vm1, %v216_v28 }
 0x132   :  { %3228 = vmatmul.mubr.msk.f32.vlgmr.msra.gmra.mxu1 %vm226_vm1, %v217_v29 }
 0x1f2   :  { %v3229_v34 = vpop.f32.mrf.mxu1 }
 0x1f3   :  { %v309_v35 = vadd.f32 %v3229_v34, %v3750_v5 }
 0x1f4   :  { %v299_v36 = vpop.f32.mrf.mxu1 }
 0x1f5   :  { %v308_v38 = vadd.f32 %v299_v36, %v3743_v2  ;;  %v3767_v40 = vadd.f32 %v3023_v37, %v309_v35  ;;  %v104_v2 = vld [vmem:[#allocation6 + $0x1] sm:$0x1] }
 0x1f6   :  { %v3838_v3 = vrot.slane %v104_v2, %v753_v63  ;;  %v108_v7 = vsub.f32 1.0, %v104_v2 }
 0x1f7   :  { %v3765_v39 = vadd.f32 %v3023_v37, %v308_v38 }
 0x1f8   :  { %v110_v12 = vmul.f32 -1e+30, %v108_v7 }
 0x1f9   :  { %3238 = vmatprep.mubr.msk.f32.mxu0 %vm122_vm0, %v3765_v39 }
 0x1fa   :  { %3239 = vmatmul.mubr.msk.f32.vlgmr.msra.gmra.mxu0 %vm122_vm0, %v3767_v40  ;;  %v3843_v18 = vrot.slane %v110_v12, %v753_v63 }
 0x1fb   :  { %3242 = vmatpush3.msra.mxu0 %v414_v41  ;;  %3249 = vmatprep.mubr.msk.f32.mxu0 %vm3651_vm2, %v3650_v33 }
 0x1fc   :  { %3243 = vmatprep.subr.mxu0 %v3650_v33 }
 0x1fd   :  { %3244 = vmatpush3.msra.mxu0 %v413_v42 }
 0x1fe   :  { %3245 = vmatprep.subr.mxu0 %v3650_v33 }
 0x1ff   :  { %3246 = vmatpush3.msra.mxu0 %v412_v43 }
 0x200   :  { %3247 = vmatprep.subr.mxu0 %v3650_v33 }
 0x201   :  { %3248 = vmatpush3.msra.mxu0 %v411_v44 }
 0x202   :  { %3250 = vmatmul.mubr.msk.f32.vlgmr.msra.gmra.mxu0 %vm122_vm0, %v102_v45  ;;  %3262 = vmatprep.subr.mxu0 %v3650_v33 }
 0x203   :  { %3264 = vmatprep.mubr.msk.f32.mxu0 %vm3651_vm2, %v3650_v33 }
 0x2ba   :  { %v3240_v46 = vpop.f32.mrf.mxu0 }
 0x2bb   :  { %v3795_v52 = vadd.f32 %v3240_v46, %v3024_v47 }
 0x2bc   :  { %v402_v48 = vpop.f32.mrf.mxu0 }
 0x2bd   :  { %v3785_v49 = vadd.f32 %v3024_v47, %v402_v48  ;;  %v3808_v55 = vadd.f32 %v3029_v50, %v3795_v52  ;;  %v3829_v60 = vadd.f32 %v3028_v57, %v3795_v52 }
 0x2bf   :  { %592 = vrot.lane.b32.xlu0 %v3785_v49, %s3652_s25  ;;  %v3793_v51 = vadd.f32 %v3029_v50, %v3785_v49  ;;  %v3820_v58 = vadd.f32 %v3028_v57, %v3785_v49 }
 0x2c1   :  { %3254 = vmatprep.mubr.msk.f32.mxu1 %vm506_vm3, %v3793_v51 }
 0x2c2   :  { %v3799_v53 = vpop.f32.mrf.mxu0 }
 0x2c3   :  { %3252 = vmatprep.subr.msk.mxu1 %vm506_vm3, %v3799_v53  ;;  %670 = vrot.lane.b32.xlu0 %v3795_v52, %s3652_s25 }
 0x2c4   :  { %3253 = vmatpush3.xpose.msk.msra.mxu1 %vm506_vm3, %v3799_v53  ;;  %v3251_v54 = vpop.f32.mrf.mxu0 }
 0x2c5   :  { %3257 = vmatprep.subr.mxu1 %v3650_v33 }
 0x2c7   :  { %3255 = vmatmul.mubr.msk.f32.vlgmr.msra.gmra.mxu1 %vm506_vm3, %v3808_v55 }
 0x2c8   :  { %3259 = vmatprep.mubr.msk.f32.mxu1 %vm3651_vm2, %v3650_v33 }
 0x331   :  { %v593_v56 = vpop.permute.xlu0 %592 }
 0x332   :  { %3258 = vmatpush3.xpose.msk.msra.mxu1 %vm506_vm3, %v593_v56 }
 0x333   :  { %3267 = vmatprep.subr.mxu1 %v3650_v33 }
 0x335   :  { %v671_v59 = vpop.permute.xlu0 %670  ;;  %3260 = vmatmul.mubr.msk.f32.vlgmr.msra.gmra.mxu1 %vm506_vm3, %v3820_v58 }
 0x336   :  { %3263 = vmatpush3.xpose.msk.msra.mxu0 %vm506_vm3, %v671_v59  ;;  %3269 = vmatprep.mubr.msk.f32.mxu1 %vm3651_vm2, %v3650_v33 }
 0x337   :  { %3272 = vmatprep.subr.mxu0 %v3650_v33 }
 0x339   :  { %3265 = vmatmul.mubr.msk.f32.vlgmr.msra.gmra.mxu0 %vm506_vm3, %v3829_v60 }
 0x33a   :  { %3274 = vmatprep.mubr.msk.f32.mxu0 %vm3651_vm2, %v3650_v33 }
 0x387   :  { %v3256_v5 = vpop.f32.mrf.mxu1 }
 0x389   :  { %v582_v8 = vpop.f32.mrf.mxu1 }
 0x3f5   :  { %v665_v9 = vpop.f32.mrf.mxu1 }
 0x3f6   :  { %v666_v10 = vadd.f32 %v665_v9, %v582_v8 }
 0x3f7   :  { %v3261_v13 = vpop.f32.mrf.mxu1 }
 0x3f8   :  { %v747_v14 = vmul.f32 0.35355338, %v666_v10 }
 0x3f9   :  { %v743_v15 = vpop.f32.mrf.mxu0 }
 0x3fa   :  { %v744_v16 = vadd.f32 %v3256_v5, %v743_v15  ;;  %v761_v17 = vadd.f32 %v3840_v11, %v747_v14 }
 0x3fb   :  { %v3266_v19 = vpop.f32.mrf.mxu0 }
 0x3fc   :  { %v748_v20 = vmul.f32 0.35355338, %v744_v16  ;;  %v763_v21 = vsel %vm506_vm3, %v761_v17, -inf }
 0x3fd   :  { %764 = vmax.xlane.f32.xlu1 %v763_v21 }
 0x3fe   :  { %v762_v22 = vadd.f32 %v3843_v18, %v748_v20 }
 0x400   :  { %v766_v23 = vsel %vm506_vm3, %v762_v22, -inf }
 0x401   :  { %767 = vmax.xlane.f32.xlu1 %v766_v23 }
 0x486   :  { %v765_v24 = vpop.xlane.xlu1 %764 }
 0x487   :  { %v769_v25 = vsub.f32 %v761_v17, %v765_v24 }
 0x489   :  { %v771_v26 = vmul.f32 1.442695, %v769_v25 }
 0x48a   :  { %v768_v27 = vpop.xlane.xlu1 %767 }
 0x48b   :  { %3452 = vpow2.f32 %v771_v26  ;;  %v770_v28 = vsub.f32 %v762_v22, %v768_v27 }
 0x48d   :  { %v773_v29 = vmul.f32 1.442695, %v770_v28 }
 0x48f   :  { %3454 = vpow2.f32 %v773_v29 }
 0x498   :  { %v3453_v30 = vpop.eup %3452 }
 0x499   :  { %v775_v31 = vsel %vm506_vm3, %v3453_v30, 0.0 }
 0x49a   :  { %776 = vadd.xlane.f32.xlu0 %v775_v31 }
 0x49c   :  { %v3455_v32 = vpop.eup %3454 }
 0x49d   :  { %v778_v34 = vsel %vm506_vm3, %v3455_v32, 0.0 }
 0x49e   :  { %779 = vadd.xlane.f32.xlu1 %v778_v34 }
 0x4af   :  { %799 = vrot.lane.b32.xlu1 %v3785_v49, %s3653_s28 }
 0x4b0   :  { %1040 = vrot.lane.b32.xlu0 %v3785_v49, %s3654_s5 }
 0x4b3   :  { %955 = vrot.lane.b32.xlu1 %v3799_v53, %s3655_s30 }
 0x4b7   :  { %875 = vrot.lane.b32.xlu1 %v3795_v52, %s3653_s28 }
 0x4bb   :  { %951 = vrot.lane.b32.xlu1 %v3793_v51, %s3655_s30 }
 0x4bf   :  { %953 = vrot.lane.b32.xlu1 %v3808_v55, %s3655_s30 }
 0x4c3   :  { %1118 = vrot.lane.b32.xlu1 %v3795_v52, %s3654_s5 }
 0x4c7   :  { %1038 = vrot.lane.b32.xlu1 %v3820_v58, %s3655_s30 }
 0x4cb   :  { %1116 = vrot.lane.b32.xlu1 %v3829_v60, %s3655_s30 }
 0x523   :  { %v777_v35 = vpop.xlane.xlu0 %776 }
 0x524   :  { %3456 = vrcp.f32 %v777_v35 }
 0x527   :  { %v780_v36 = vpop.xlane.xlu1 %779  ;;  %v1041_v50 = vpop.permute.xlu0 %1040 }
 0x528   :  { %3458 = vrcp.f32 %v780_v36 }
 0x52b   :  { %v800_v37 = vpop.permute.xlu1 %799 }
 0x52c   :  { %3268 = vmatpush3.msra.mxu1 %v800_v37 }
 0x52f   :  { %v956_v38 = vpop.permute.xlu1 %955 }
 0x530   :  { %3277 = vmatprep.subr.msk.mxu1 %vm506_vm3, %v956_v38 }
 0x531   :  { %v3457_v41 = vpop.eup %3456 }
 0x532   :  { %v783_v42 = vmul.f32 %v3457_v41, %v3453_v30 }
 0x533   :  { %v876_v43 = vpop.permute.xlu1 %875 }
 0x534   :  { %3273 = vmatpush3.msra.mxu0 %v876_v43  ;;  %v797_v44 = vmul.f32 %v3836_v1, %v783_v42 }
 0x535   :  { %v3459_v45 = vpop.eup %3458  ;;  %3282 = vmatprep.subr.mxu0 %v3650_v33 }
 0x536   :  { %3270 = vmatmul.mubr.msk.f32.vlgmr.msra.gmra.mxu1 %vm506_vm3, %v797_v44  ;;  %v784_v46 = vmul.f32 %v3459_v45, %v3455_v32 }
 0x537   :  { %3278 = vmatpush3.xpose.msk.msra.mxu1 %vm506_vm3, %v956_v38  ;;  %v952_v47 = vpop.permute.xlu1 %951 }
 0x538   :  { %3279 = vmatprep.mubr.msk.f32.mxu1 %vm506_vm3, %v952_v47  ;;  %v798_v48 = vmul.f32 %v3838_v3, %v784_v46  ;;  %3287 = vmatprep.subr.mxu1 %v3650_v33 }
 0x53a   :  { %3275 = vmatmul.mubr.msk.f32.vlgmr.msra.gmra.mxu0 %vm506_vm3, %v798_v48 }
 0x53b   :  { %3283 = vmatpush3.xpose.msk.msra.mxu0 %vm506_vm3, %v1041_v50  ;;  %v954_v54 = vpop.permute.xlu1 %953  ;;  %3284 = vmatprep.mubr.msk.f32.mxu0 %vm3651_vm2, %v3650_v33 }
 0x53c   :  { %3280 = vmatmul.mubr.msk.f32.vlgmr.msra.gmra.mxu1 %vm506_vm3, %v954_v54  ;;  %3292 = vmatprep.subr.mxu0 %v3650_v33 }
 0x53d   :  { %3289 = vmatprep.mubr.msk.f32.mxu1 %vm3651_vm2, %v3650_v33 }
 0x53f   :  { %v1119_v56 = vpop.permute.xlu1 %1118 }
 0x540   :  { %3288 = vmatpush3.xpose.msk.msra.mxu1 %vm506_vm3, %v1119_v56 }
 0x541   :  { %3297 = vmatprep.subr.mxu1 %v3650_v33 }
 0x543   :  { %v1039_v57 = vpop.permute.xlu1 %1038 }
 0x544   :  { %3285 = vmatmul.mubr.msk.f32.vlgmr.msra.gmra.mxu0 %vm506_vm3, %v1039_v57 }
 0x545   :  { %3294 = vmatprep.mubr.msk.f32.mxu0 %vm3651_vm2, %v3650_v33 }
 0x547   :  { %v1117_v59 = vpop.permute.xlu1 %1116 }
 0x548   :  { %3290 = vmatmul.mubr.msk.f32.vlgmr.msra.gmra.mxu1 %vm506_vm3, %v1117_v59 }
 0x549   :  { %3299 = vmatprep.mubr.msk.f32.mxu1 %vm3651_vm2, %v3650_v33 }
 0x5f6   :  { %v3883_v61 = vpop.f32.mrf.mxu1 }
 0x5f8   :  { %v3271_v62 = vpop.f32.mrf.mxu1 }
 0x5fa   :  { %v3885_v63 = vpop.f32.mrf.mxu0 }
 0x5fc   :  { %v3276_v0 = vpop.f32.mrf.mxu0  ;;  %v3281_v2 = vpop.f32.mrf.mxu1 }
 0x5fe   :  { %v1029_v4 = vpop.f32.mrf.mxu1 }
 0x604   :  { %v1112_v5 = vpop.f32.mrf.mxu0 }
 0x605   :  { %v1113_v6 = vadd.f32 %v1112_v5, %v1029_v4 }
 0x606   :  { %v3286_v7 = vpop.f32.mrf.mxu0 }
 0x607   :  { %v1194_v8 = vmul.f32 0.35355338, %v1113_v6 }
 0x608   :  { %v1190_v9 = vpop.f32.mrf.mxu1 }
 0x609   :  { %v1191_v10 = vadd.f32 %v3281_v2, %v1190_v9  ;;  %v1196_v12 = vadd.f32 %v1194_v8, %v3840_v11 }
 0x60a   :  { %v3291_v13 = vpop.f32.mrf.mxu1 }
 0x60b   :  { %v1195_v14 = vmul.f32 0.35355338, %v1191_v10  ;;  %v1198_v15 = vsel %vm506_vm3, %v1196_v12, -inf }
 0x60c   :  { %1199 = vmax.xlane.f32.xlu1 %v1198_v15 }
 0x60d   :  { %v1197_v16 = vadd.f32 %v1195_v14, %v3843_v18 }
 0x60f   :  { %v1201_v17 = vsel %vm506_vm3, %v1197_v16, -inf }
 0x610   :  { %1202 = vmax.xlane.f32.xlu0 %v1201_v17 }
 0x61d   :  { %1378 = vrot.lane.b32.xlu1 %v3799_v53, %s3656_s10 }
 0x621   :  { %1298 = vrot.lane.b32.xlu1 %v3795_v52, %s3648_s29 }
 0x625   :  { %1463 = vrot.lane.b32.xlu1 %v3785_v49, %s3657_s11 }
 0x626   :  { %1222 = vrot.lane.b32.xlu0 %v3785_v49, %s3648_s29  ;;  %s3658_s29 = smov 48  }
 0x695   :  { %v1200_v19 = vpop.xlane.xlu1 %1199 }
 0x696   :  { %v1204_v20 = vsub.f32 %v1196_v12, %v1200_v19 }
 0x698   :  { %v1206_v21 = vmul.f32 1.442695, %v1204_v20 }
 0x699   :  { %v1203_v22 = vpop.xlane.xlu0 %1202  ;;  %v1379_v23 = vpop.permute.xlu1 %1378 }
 0x69a   :  { %3460 = vpow2.f32 %v1206_v21  ;;  %v1205_v24 = vsub.f32 %v1197_v16, %v1203_v22 }
 0x69c   :  { %v1208_v25 = vmul.f32 1.442695, %v1205_v24 }
 0x69d   :  { %v1223_v26 = vpop.permute.xlu0 %1222  ;;  %v1299_v27 = vpop.permute.xlu1 %1298 }
 0x69e   :  { %3462 = vpow2.f32 %v1208_v25  ;;  %3293 = vmatpush3.msra.mxu0 %v1223_v26  ;;  %3298 = vmatpush3.msra.mxu1 %v1299_v27 }
 0x69f   :  { %3302 = vmatprep.subr.msk.mxu0 %vm506_vm3, %v1379_v23  ;;  %3307 = vmatprep.subr.mxu1 %v3650_v33 }
 0x6a1   :  { %v1464_v32 = vpop.permute.xlu1 %1463 }
 0x6a7   :  { %v3461_v28 = vpop.eup %3460 }
 0x6a8   :  { %v1210_v29 = vsel %vm506_vm3, %v3461_v28, 0.0 }
 0x6a9   :  { %1211 = vadd.xlane.f32.xlu0 %v1210_v29 }
 0x6ab   :  { %v3463_v30 = vpop.eup %3462 }
 0x6ac   :  { %v1213_v31 = vsel %vm506_vm3, %v3463_v30, 0.0 }
 0x6ad   :  { %1214 = vadd.xlane.f32.xlu1 %v1213_v31 }
 0x6be   :  { %1461 = vrot.lane.b32.xlu1 %v3820_v58, %s3656_s10 }
 0x6bf   :  { %1374 = vrot.lane.b32.xlu0 %v3793_v51, %s3656_s10 }
 0x6c2   :  { %1539 = vrot.lane.b32.xlu1 %v3829_v60, %s3656_s10 }
 0x6c3   :  { %1376 = vrot.lane.b32.xlu0 %v3808_v55, %s3656_s10 }
 0x6c7   :  { %1541 = vrot.lane.b32.xlu0 %v3795_v52, %s3657_s11 }
 0x732   :  { %v1212_v34 = vpop.xlane.xlu0 %1211 }
 0x733   :  { %3464 = vrcp.f32 %v1212_v34 }
 0x736   :  { %v1215_v35 = vpop.xlane.xlu1 %1214  ;;  %v1375_v36 = vpop.permute.xlu0 %1374 }
 0x737   :  { %3466 = vrcp.f32 %v1215_v35 }
 0x73a   :  { %v1377_v41 = vpop.permute.xlu0 %1376  ;;  %v1462_v45 = vpop.permute.xlu1 %1461 }
 0x73e   :  { %v1542_v47 = vpop.permute.xlu0 %1541  ;;  %v1540_v48 = vpop.permute.xlu1 %1539 }
 0x740   :  { %v3465_v37 = vpop.eup %3464 }
 0x741   :  { %v1218_v38 = vmul.f32 %v3465_v37, %v3461_v28 }
 0x743   :  { %v1220_v42 = vmul.f32 %v1218_v38, %v3836_v1 }
 0x744   :  { %v3467_v43 = vpop.eup %3466 }
 0x745   :  { %3295 = vmatmul.mubr.msk.f32.vlgmr.msra.gmra.mxu0 %vm506_vm3, %v1220_v42  ;;  %v1219_v44 = vmul.f32 %v3467_v43, %v3463_v30 }
 0x746   :  { %3303 = vmatpush3.xpose.msk.msra.mxu0 %vm506_vm3, %v1379_v23  ;;  %3304 = vmatprep.mubr.msk.f32.mxu0 %vm506_vm3, %v1375_v36 }
 0x747   :  { %3312 = vmatprep.subr.mxu0 %v3650_v33  ;;  %v1221_v46 = vmul.f32 %v1219_v44, %v3838_v3 }
 0x749   :  { %3300 = vmatmul.mubr.msk.f32.vlgmr.msra.gmra.mxu1 %vm506_vm3, %v1221_v46  ;;  %3305 = vmatmul.mubr.msk.f32.vlgmr.msra.gmra.mxu0 %vm506_vm3, %v1377_v41 }
 0x74a   :  { %3308 = vmatpush3.xpose.msk.msra.mxu1 %vm506_vm3, %v1464_v32  ;;  %3313 = vmatpush3.xpose.msk.msra.mxu0 %vm506_vm3, %v1542_v47 }
 0x74b   :  { %3309 = vmatprep.mubr.msk.f32.mxu1 %vm3651_vm2, %v3650_v33  ;;  %3314 = vmatprep.mubr.msk.f32.mxu0 %vm3651_vm2, %v3650_v33 }
 0x74c   :  { %3317 = vmatprep.subr.mxu1 %v3650_v33  ;;  %3322 = vmatprep.subr.mxu0 %v3650_v33 }
 0x74d   :  { %3310 = vmatmul.mubr.msk.f32.vlgmr.msra.gmra.mxu1 %vm506_vm3, %v1462_v45  ;;  %3315 = vmatmul.mubr.msk.f32.vlgmr.msra.gmra.mxu0 %vm506_vm3, %v1540_v48 }
 0x74e   :  { %3319 = vmatprep.mubr.msk.f32.mxu1 %vm3651_vm2, %v3650_v33  ;;  %3324 = vmatprep.mubr.msk.f32.mxu0 %vm3651_vm2, %v3650_v33 }
 0x805   :  { %v3928_v50 = vpop.f32.mrf.mxu0 }
 0x807   :  { %v3296_v54 = vpop.f32.mrf.mxu0 }
 0x809   :  { %v3930_v56 = vpop.f32.mrf.mxu1  ;;  %v3306_v57 = vpop.f32.mrf.mxu0 }
 0x80b   :  { %v3301_v59 = vpop.f32.mrf.mxu1  ;;  %v1452_v62 = vpop.f32.mrf.mxu0 }
 0x80d   :  { %v1535_v0 = vpop.f32.mrf.mxu1  ;;  %v1613_v2 = vpop.f32.mrf.mxu0 }
 0x80e   :  { %v1536_v4 = vadd.f32 %v1535_v0, %v1452_v62  ;;  %v1614_v5 = vadd.f32 %v3306_v57, %v1613_v2 }
 0x80f   :  { %v3311_v6 = vpop.f32.mrf.mxu1  ;;  %v3316_v7 = vpop.f32.mrf.mxu0 }
 0x810   :  { %v1617_v8 = vmul.f32 0.35355338, %v1536_v4  ;;  %v1618_v9 = vmul.f32 0.35355338, %v1614_v5 }
 0x812   :  { %v1619_v10 = vadd.f32 %v1617_v8, %v3840_v11  ;;  %v1620_v12 = vadd.f32 %v1618_v9, %v3843_v18 }
 0x814   :  { %v1621_v13 = vsel %vm506_vm3, %v1619_v10, -inf  ;;  %v1624_v14 = vsel %vm506_vm3, %v1620_v12, -inf }
 0x815   :  { %1622 = vmax.xlane.f32.xlu0 %v1621_v13  ;;  %1625 = vmax.xlane.f32.xlu1 %v1624_v14 }
 0x826   :  { %1645 = vrot.lane.b32.xlu1 %v3785_v49, %s3658_s29 }
 0x82a   :  { %1721 = vrot.lane.b32.xlu1 %v3795_v52, %s3658_s29 }
 0x82b   :  { %1801 = vrot.lane.b32.xlu0 %v3799_v53, %s3659_s14 }
 0x82e   :  { %1797 = vrot.lane.b32.xlu1 %v3793_v51, %s3659_s14 }
 0x82f   :  { %1799 = vrot.lane.b32.xlu0 %v3808_v55, %s3659_s14 }
 0x832   :  { %1886 = vrot.lane.b32.xlu1 %v3785_v49, %s3660_s15 }
 0x836   :  { %1884 = vrot.lane.b32.xlu1 %v3820_v58, %s3659_s14 }
 0x89e   :  { %v1623_v15 = vpop.xlane.xlu0 %1622  ;;  %v1626_v16 = vpop.xlane.xlu1 %1625 }
 0x89f   :  { %v1627_v17 = vsub.f32 %v1619_v10, %v1623_v15  ;;  %v1628_v19 = vsub.f32 %v1620_v12, %v1626_v16 }
 0x8a1   :  { %v1629_v20 = vmul.f32 1.442695, %v1627_v17  ;;  %v1631_v21 = vmul.f32 1.442695, %v1628_v19 }
 0x8a2   :  { %v1802_v22 = vpop.permute.xlu0 %1801  ;;  %v1646_v23 = vpop.permute.xlu1 %1645 }
 0x8a3   :  { %3468 = vpow2.f32 %v1629_v20  ;;  %3318 = vmatpush3.msra.mxu1 %v1646_v23 }
 0x8a4   :  { %3327 = vmatprep.subr.msk.mxu1 %vm506_vm3, %v1802_v22  ;;  %3470 = vpow2.f32 %v1631_v21 }
 0x8a6   :  { %v1722_v51 = vpop.permute.xlu1 %1721  ;;  %v1800_v25 = vpop.permute.xlu0 %1799 }
 0x8a7   :  { %3323 = vmatpush3.msra.mxu0 %v1722_v51  ;;  %v2254_v51 = vld [vmem:[#allocation8 + $0x80] sm:$0xff] }
 0x8a8   :  { %3332 = vmatprep.subr.mxu0 %v3650_v33 }
 0x8aa   :  { %v1798_v29 = vpop.permute.xlu1 %1797 }
 0x8ae   :  { %v1887_v35 = vpop.permute.xlu1 %1886 }
 0x8b0   :  { %v3469_v53 = vpop.eup %3468 }
 0x8b1   :  { %v1633_v55 = vsel %vm506_vm3, %v3469_v53, 0.0  ;;  %v3471_v58 = vpop.eup %3470 }
 0x8b2   :  { %1634 = vadd.xlane.f32.xlu0 %v1633_v55  ;;  %v1636_v24 = vsel %vm506_vm3, %v3471_v58, 0.0  ;;  %v1885_v37 = vpop.permute.xlu1 %1884  ;;  %v2252_v55 = vld [vmem:[#allocation8 + $0x10] sm:$0xff] }
 0x8b6   :  { %1637 = vadd.xlane.f32.xlu0 %v1636_v24 }
 0x8cc   :  { %1964 = vrot.lane.b32.xlu0 %v3795_v52, %s3660_s15 }
 0x8d0   :  { %1962 = vrot.lane.b32.xlu0 %v3829_v60, %s3659_s14 }
 0x93b   :  { %v1635_v26 = vpop.xlane.xlu0 %1634 }
 0x93c   :  { %3472 = vrcp.f32 %v1635_v26 }
 0x93f   :  { %v1638_v27 = vpop.xlane.xlu0 %1637 }
 0x940   :  { %3474 = vrcp.f32 %v1638_v27  ;;  %v105_v27 = vld [vmem:[%s4075_s3] sm:$0xff] }
 0x943   :  { %v1965_v36 = vpop.permute.xlu0 %1964 }
 0x947   :  { %v1963_v38 = vpop.permute.xlu0 %1962 }
 0x949   :  { %v3473_v28 = vpop.eup %3472 }
 0x94a   :  { %v1641_v30 = vmul.f32 %v3473_v28, %v3469_v53  ;;  %v2253_v53 = vld [vmem:[#allocation8 + $0x48] sm:$0xff] }
 0x94c   :  { %v1643_v31 = vmul.f32 %v1641_v30, %v3836_v1 }
 0x94d   :  { %v3475_v32 = vpop.eup %3474 }
 0x94e   :  { %3320 = vmatmul.mubr.msk.f32.vlgmr.msra.gmra.mxu1 %vm506_vm3, %v1643_v31  ;;  %v1642_v34 = vmul.f32 %v3475_v32, %v3471_v58  ;;  %v3663_v58 = vmov 0  }
 0x94f   :  { %3328 = vmatpush3.xpose.msk.msra.mxu1 %vm506_vm3, %v1802_v22  ;;  %3329 = vmatprep.mubr.msk.f32.mxu1 %vm506_vm3, %v1798_v29 }
 0x950   :  { %3337 = vmatprep.subr.mxu1 %v3650_v33  ;;  %v1644_v60 = vmul.f32 %v1642_v34, %v3838_v3  ;;  %3443 = vset.pattern.permute.xlu0 %v3663_v58 }
 0x951   :  { %3442 = vset.pattern.permute.xlu1 %v3663_v58 }
 0x952   :  { %3325 = vmatmul.mubr.msk.f32.vlgmr.msra.gmra.mxu0 %vm506_vm3, %v1644_v60  ;;  %3330 = vmatmul.mubr.msk.f32.vlgmr.msra.gmra.mxu1 %vm506_vm3, %v1800_v25  ;;  %v106_v25 = vld [vmem:[%s4075_s3 + $0x8] sm:$0xff] }
 0x953   :  { %3333 = vmatpush3.xpose.msk.msra.mxu0 %vm506_vm3, %v1887_v35  ;;  %3338 = vmatpush3.xpose.msk.msra.mxu1 %vm506_vm3, %v1965_v36 }
 0x954   :  { %3334 = vmatprep.mubr.msk.f32.mxu0 %vm3651_vm2, %v3650_v33  ;;  %3339 = vmatprep.mubr.msk.f32.mxu1 %vm3651_vm2, %v3650_v33 }
 0x955   :  { %3342 = vmatprep.subr.mxu0 %v3650_v33  ;;  %3347 = vmatprep.subr.mxu1 %v3650_v33 }
 0x956   :  { %3335 = vmatmul.mubr.msk.f32.vlgmr.msra.gmra.mxu0 %vm506_vm3, %v1885_v37  ;;  %3340 = vmatmul.mubr.msk.f32.vlgmr.msra.gmra.mxu1 %vm506_vm3, %v1963_v38 }
 0x957   :  { %3344 = vmatprep.mubr.msk.f32.mxu0 %vm3651_vm2, %v3650_v33  ;;  %3349 = vmatprep.mubr.msk.f32.mxu1 %vm3651_vm2, %v3650_v33 }
 0xa0e   :  { %v1717_v41 = vpop.f32.mrf.mxu1 }
 0xa10   :  { %v3321_v42 = vpop.f32.mrf.mxu1 }
 0xa11   :  { %v2363_v42 = vld [vmem:[#allocation8 + $0xc8] sm:$0xff] }
 0xa12   :  { %v1793_v43 = vpop.f32.mrf.mxu0  ;;  %v3331_v44 = vpop.f32.mrf.mxu1 }
 0xa14   :  { %v3326_v45 = vpop.f32.mrf.mxu0  ;;  %v1875_v46 = vpop.f32.mrf.mxu1 }
 0xa16   :  { %v1958_v47 = vpop.f32.mrf.mxu0  ;;  %v2036_v48 = vpop.f32.mrf.mxu1 }
 0xa17   :  { %v1959_v54 = vadd.f32 %v1958_v47, %v1875_v46  ;;  %v2037_v57 = vadd.f32 %v3331_v44, %v2036_v48  ;;  %v3068_v46 = vld [vmem:[%s4078_s6 + $0x5] ss:$0 sm:$0xff] }
 0xa18   :  { %v3336_v59 = vpop.f32.mrf.mxu0  ;;  %v3341_v62 = vpop.f32.mrf.mxu1 }
 0xa19   :  { %v2040_v0 = vmul.f32 0.35355338, %v1959_v54  ;;  %v2041_v2 = vmul.f32 0.35355338, %v2037_v57 }
 0xa1b   :  { %v2043_v4 = vadd.f32 %v2041_v2, %v3843_v18  ;;  %v2042_v5 = vadd.f32 %v2040_v0, %v3840_v11 }
 0xa1d   :  { %v2047_v33 = vsel %vm506_vm3, %v2043_v4, -inf  ;;  %v2044_v6 = vsel %vm506_vm3, %v2042_v5, -inf }
 0xa1e   :  { %2048 = vmax.xlane.f32.xlu0 %v2047_v33  ;;  %2045 = vmax.xlane.f32.xlu1 %v2044_v6 }
 0xaa7   :  { %v2049_v7 = vpop.xlane.xlu0 %2048  ;;  %v2046_v8 = vpop.xlane.xlu1 %2045 }
 0xaa8   :  { %v2051_v9 = vsub.f32 %v2043_v4, %v2049_v7  ;;  %v2050_v10 = vsub.f32 %v2042_v5, %v2046_v8 }
 0xaaa   :  { %v2054_v12 = vmul.f32 1.442695, %v2051_v9  ;;  %v2052_v13 = vmul.f32 1.442695, %v2050_v10 }
 0xaac   :  { %3476 = vpow2.f32 %v2054_v12 }
 0xaad   :  { %3478 = vpow2.f32 %v2052_v13 }
 0xab9   :  { %v3477_v14 = vpop.eup %3476 }
 0xaba   :  { %v3479_v15 = vpop.eup %3478  ;;  %v2059_v18 = vsel %vm506_vm3, %v3477_v14, 0.0 }
 0xabb   :  { %2060 = vadd.xlane.f32.xlu1 %v2059_v18  ;;  %v2056_v11 = vsel %vm506_vm3, %v3479_v15, 0.0  ;;  %v2676_v18 = vld [vmem:[#allocation8 + $0x98] sm:$0xff] }
 0xabc   :  { %2057 = vadd.xlane.f32.xlu0 %v2056_v11  ;;  %v2675_v11 = vld [vmem:[#allocation8 + $0x60] sm:$0xff] }
 0xacc   :  { %2144 = vrot.lane.b32.xlu1 %v3795_v52, %s3661_s1 }
 0xad0   :  { %2222 = vrot.lane.b32.xlu1 %v3928_v50, %s3662_s16 }
 0xad2   :  { %2068 = vrot.lane.b32.xlu0 %v3785_v49, %s3661_s1 }
 0xad4   :  { %2230 = vrot.lane.b32.xlu1 %v1717_v41, %s3641_s12 }
 0xad6   :  { %2224 = vrot.lane.b32.xlu0 %v3930_v56, %s3662_s16  ;;  %v2255_v56 = vld [vmem:[#allocation8 + $0xb8] sm:$0xff] }
 0xada   :  { %2232 = vrot.lane.b32.xlu0 %v1793_v43, %s3641_s12  ;;  %s3664_s12 = smov 24   ;;  %v2362_v43 = vld [vmem:[#allocation8 + $0x90] sm:$0xff] }
 0xb44   :  { %v2061_v16 = vpop.xlane.xlu1 %2060 }
 0xb45   :  { %v2058_v17 = vpop.xlane.xlu0 %2057  ;;  %3480 = vrcp.f32 %v2061_v16  ;;  %v2674_v16 = vld [vmem:[#allocation8 + $0x28] sm:$0xff] }
 0xb46   :  { %3482 = vrcp.f32 %v2058_v17 }
 0xb48   :  { %v2145_v19 = vpop.permute.xlu1 %2144 }
 0xb49   :  { %v2069_v20 = vpop.permute.xlu0 %2068  ;;  %3348 = vmatpush3.msra.mxu1 %v2145_v19 }
 0xb4a   :  { %3343 = vmatpush3.msra.mxu0 %v2069_v20  ;;  %3363 = vmatprep.subr.mxu1 %v2363_v42  ;;  %v3075_v20 = vld [vmem:[#allocation11 + $0x1] ss:$0 sm:$0xff] }
 0xb4b   :  { %3352 = vmatprep.subr.mxu0 %v2255_v56 }
 0xb4c   :  { %v2223_v29 = vpop.permute.xlu1 %2222 }
 0xb4d   :  { %v2225_v28 = vpop.permute.xlu0 %2224  ;;  %v2244_v34 = vsel %vm506_vm3, %v3883_v61, %v2223_v29  ;;  %v2360_v61 = vld [vmem:[#allocation8 + $0x20] sm:$0xff] }
 0xb4e   :  { %v2245_v32 = vsel %vm506_vm3, %v3885_v63, %v2225_v28  ;;  %v2361_v63 = vld [vmem:[#allocation8 + $0x58] sm:$0xff] }
 0xb50   :  { %v2231_v31 = vpop.permute.xlu1 %2230 }
 0xb51   :  { %v2233_v30 = vpop.permute.xlu0 %2232  ;;  %v2247_v60 = vsel %vm2246_vm4, %v2244_v34, %v2231_v31 }
 0xb52   :  { %v3481_v52 = vpop.eup %3480  ;;  %v2248_v35 = vsel %vm2246_vm4, %v2245_v32, %v2233_v30  ;;  %v3079_v32 = vld [vmem:[#allocation11 + $0x5] ss:$0 sm:$0xff] }
 0xb53   :  { %v3483_v21 = vpop.eup %3482  ;;  %v2065_v50 = vmul.f32 %v3481_v52, %v3477_v14  ;;  %v3076_v52 = vld [vmem:[#allocation11 + $0x2] ss:$0 sm:$0xff] }
 0xb54   :  { %v2064_v22 = vmul.f32 %v3483_v21, %v3479_v15  ;;  %v2677_v15 = vld [vmem:[#allocation8 + $0xd0] sm:$0xff] }
 0xb55   :  { %v2067_v49 = vmul.f32 %v2065_v50, %v3838_v3  ;;  %v3077_v50 = vld [vmem:[#allocation11 + $0x3] ss:$0 sm:$0xff] }
 0xb56   :  { %v2066_v23 = vmul.f32 %v2064_v22, %v3836_v1 }
 0xb57   :  { %3350 = vmatmul.mubr.msk.f32.vlgmr.msra.gmra.mxu1 %vm506_vm3, %v2067_v49  ;;  %v3078_v49 = vld [vmem:[#allocation11 + $0x4] ss:$0 sm:$0xff] }
 0xb58   :  { %3345 = vmatmul.mubr.msk.f32.vlgmr.msra.gmra.mxu0 %vm506_vm3, %v2066_v23  ;;  %3364 = vmatpush3.msra.mxu1 %v2363_v42 }
 0xb59   :  { %3353 = vmatpush3.msra.mxu0 %v2255_v56  ;;  %3365 = vmatprep.subr.mxu1 %v2362_v43 }
 0xb5a   :  { %3354 = vmatprep.subr.mxu0 %v2254_v51  ;;  %3366 = vmatpush3.msra.mxu1 %v2362_v43 }
 0xb5b   :  { %3355 = vmatpush3.msra.mxu0 %v2254_v51  ;;  %3367 = vmatprep.subr.mxu1 %v2361_v63 }
 0xb5c   :  { %3356 = vmatprep.subr.mxu0 %v2253_v53  ;;  %3368 = vmatpush3.msra.mxu1 %v2361_v63 }
 0xb5d   :  { %3357 = vmatpush3.msra.mxu0 %v2253_v53  ;;  %3369 = vmatprep.subr.mxu1 %v2360_v61 }
 0xb5e   :  { %3358 = vmatprep.subr.mxu0 %v2252_v55  ;;  %3370 = vmatpush3.msra.mxu1 %v2360_v61 }
 0xb5f   :  { %3359 = vmatpush3.msra.mxu0 %v2252_v55 }
 0xb60   :  { %3374 = vmatprep.subr.mxu0 %v2677_v15 }
 0xc17   :  { %v2216_v1 = vpop.f32.mrf.mxu1 }
 0xc18   :  { %v2140_v3 = vpop.f32.mrf.mxu0  ;;  %2240 = vrot.lane.b32.xlu0 %v2216_v1, %s3664_s12 }
 0xc19   :  { %2238 = vrot.lane.b32.xlu1 %v2140_v3, %s3664_s12  ;;  %v3351_v24 = vpop.f32.mrf.mxu1 }
 0xc1a   :  { %v3346_v26 = vpop.f32.mrf.mxu0 }
 0xc1c   :  { %2355 = vperm.xlu0 %3443, %v106_v25   ;;  %v3074_v25 = vld [vmem:[#allocation11] ss:$0 sm:$0xff] }
 0xc1d   :  { %2350 = vperm.xlu1 %3442, %v105_v27  }
 0xc8a   :  { %v2241_v36 = vpop.permute.xlu0 %2240 }
 0xc8b   :  { %v2251_v37 = vsel %vm2249_vm5, %v2248_v35, %v2241_v36  ;;  %v2239_v38 = vpop.permute.xlu1 %2238 }
 0xc8c   :  { %v2250_v41 = vsel %vm2249_vm5, %v2247_v60, %v2239_v38  ;;  %v3080_v60 = vld [vmem:[#allocation11 + $0x6] ss:$0 sm:$0xff] }
 0xc8d   :  { %3360 = vmatprep.mubr.msk.f32.mxu0 %vm122_vm0, %v2250_v41 }
 0xc8e   :  { %3361 = vmatmul.mubr.msk.f32.vlgmr.msra.gmra.mxu0 %vm122_vm0, %v2251_v37 }
 0xc8f   :  { %3375 = vmatpush3.msra.mxu0 %v2677_v15 }
 0xc90   :  { %3376 = vmatprep.subr.mxu0 %v2676_v18 }
 0xc91   :  { %3377 = vmatpush3.msra.mxu0 %v2676_v18 }
 0xc92   :  { %3378 = vmatprep.subr.mxu0 %v2675_v11 }
 0xc93   :  { %3379 = vmatpush3.msra.mxu0 %v2675_v11 }
 0xc94   :  { %3380 = vmatprep.subr.mxu0 %v2674_v16 }
 0xc95   :  { %3381 = vmatpush3.msra.mxu0 %v2674_v16 }
 0xc97   :  { %v4012_v62 = vpop.permute.xlu0 %2355 }
 0xc98   :  { %v4008_v57 = vpop.permute.xlu1 %2350 }
 0xd4e   :  { %v3362_v44 = vpop.f32.mrf.mxu0 }
 0xd4f   :  { %v2338_v45 = vadd.f32 %v3362_v44, %v3767_v40 }
 0xd50   :  { %v2328_v47 = vpop.f32.mrf.mxu0 }
 0xd51   :  { %v2337_v48 = vadd.f32 %v2328_v47, %v3765_v39  ;;  %v4006_v54 = vadd.f32 %v3068_v46, %v2338_v45  ;;  %v3069_v39 = vld [vmem:[%s4078_s6 + $0x6] ss:$0 sm:$0xff] }
 0xd53   :  { %v4010_v59 = vadd.f32 %v3068_v46, %v2337_v48  ;;  %v2359_v40 = vmul.f32 %v4012_v62, %v4006_v54 }
 0xd55   :  { %v2358_v0 = vmul.f32 %v4008_v57, %v4010_v59 }
 0xd57   :  { %3371 = vmatprep.mubr.msk.f32.mxu1 %vm122_vm0, %v2358_v0 }
 0xd58   :  { %3372 = vmatmul.mubr.msk.f32.vlgmr.msra.gmra.mxu1 %vm122_vm0, %v2359_v40 }
 0xe18   :  { %v3373_v2 = vpop.f32.mrf.mxu1 }
 0xe19   :  { %v2449_v4 = vadd.f32 %v3373_v2, %v3069_v39 }
 0xe1a   :  { %v2443_v5 = vpop.f32.mrf.mxu1 }
 0xe1b   :  { %v3073_v33 = vmul.f32 -1.442695, %v2449_v4  ;;  %v2444_v6 = vadd.f32 %v3069_v39, %v2443_v5 }
 0xe1d   :  { %v3072_v7 = vmul.f32 -1.442695, %v2444_v6  ;;  %3484 = vpow2.f32 %v3073_v33 }
 0xe1f   :  { %3486 = vpow2.f32 %v3072_v7 }
 0xe2a   :  { %v3485_v8 = vpop.eup %3484 }
 0xe2b   :  { %v2459_v12 = vadd.f32 1.0, %v3485_v8 }
 0xe2c   :  { %v3487_v9 = vpop.eup %3486 }
 0xe2d   :  { %v2458_v10 = vadd.f32 1.0, %v3487_v9 }
 0xe2f   :  { %3488 = vrcp.f32 %v2458_v10 }
 0xe30   :  { %3490 = vrcp.f32 %v2459_v12 }
 0xe3c   :  { %v3489_v13 = vpop.eup %3488 }
 0xe3d   :  { %2466 = vrot.lane.b32.xlu1 %v3489_v13, %s3652_s25  ;;  %v3491_v14 = vpop.eup %3490 }
 0xe41   :  { %2468 = vrot.lane.b32.xlu1 %v3491_v14, %s3652_s25 }
 0xeaf   :  { %v2467_v17 = vpop.permute.xlu1 %2466 }
 0xeb0   :  { %v2472_v19 = vmul.f32 %v2467_v17, %v2444_v6 }
 0xeb2   :  { %v2476_v21 = vrot.slane %v2472_v19, 5 }
 0xeb3   :  { %v2469_v22 = vpop.permute.xlu1 %2468 }
 0xeb4   :  { %v2481_v23 = vsel %vm2480_vm6, 0.0, %v2476_v21  ;;  %v2483_v56 = vsel %vm2480_vm6, %v2476_v21, 0.0  ;;  %v2473_v24 = vmul.f32 %v2469_v22, %v2449_v4 }
 0xeb5   :  { %v2508_v51 = vmul.f32 %v3075_v20, %v2481_v23  ;;  %v2509_v53 = vmul.f32 %v3075_v20, %v2483_v56  ;;  %v2533_v55 = vmul.f32 %v3076_v52, %v2481_v23  ;;  %v2534_v58 = vmul.f32 %v3076_v52, %v2483_v56 }
 0xeb6   :  { %v2558_v1 = vmul.f32 %v3077_v50, %v2481_v23  ;;  %v2559_v3 = vmul.f32 %v3077_v50, %v2483_v56  ;;  %v2583_v28 = vmul.f32 %v3078_v49, %v2481_v23  ;;  %v2584_v29 = vmul.f32 %v3078_v49, %v2483_v56 }
 0xeb7   :  { %v2517_v26 = vrot.slane %v2508_v51, 1  ;;  %v2518_v27 = vrot.slane %v2509_v53, 1  ;;  %v2542_v30 = vrot.slane %v2533_v55, 2  ;;  %v2543_v31 = vrot.slane %v2534_v58, 2 }
 0xeb8   :  { %v2567_v35 = vrot.slane %v2558_v1, 3  ;;  %v2568_v36 = vrot.slane %v2559_v3, 3  ;;  %v2498_v37 = vmul.f32 %v3074_v25, %v2481_v23  ;;  %v2592_v38 = vrot.slane %v2583_v28, 4 }
 0xeb9   :  { %v2519_v34 = vsel %vm2516_vm7, %v2517_v26, %v2518_v27  ;;  %v2593_v41 = vrot.slane %v2584_v29, 4  ;;  %v2477_v42 = vrot.slane %v2473_v24, 5  ;;  %v2544_v63 = vsel %vm2541_vm8, %v2542_v30, %v2543_v31 }
 0xeba   :  { %v2525_v43 = vadd.f32 %v2519_v34, %v2498_v37  ;;  %v2608_v61 = vmul.f32 %v3079_v32, %v2481_v23  ;;  %v2609_v44 = vmul.f32 %v3079_v32, %v2483_v56  ;;  %v2569_v45 = vsel %vm2566_vm9, %v2567_v35, %v2568_v36  ;;  %v3081_v36 = vld [vmem:[%s4078_s6 + $0x7] ss:$0 sm:$0xff] }
 0xebb   :  { %v2632_v46 = vmul.f32 %v3080_v60, %v2481_v23  ;;  %v2482_v47 = vsel %vm2480_vm6, 0.0, %v2477_v42  ;;  %v2484_v48 = vsel %vm2480_vm6, %v2477_v42, 0.0  ;;  %v2633_v0 = vmul.f32 %v3080_v60, %v2483_v56 }
 0xebc   :  { %v2510_v40 = vmul.f32 %v3075_v20, %v2482_v47  ;;  %v2511_v39 = vmul.f32 %v3075_v20, %v2484_v48  ;;  %v2535_v2 = vmul.f32 %v3076_v52, %v2482_v47  ;;  %v2536_v4 = vmul.f32 %v3076_v52, %v2484_v48 }
 0xebd   :  { %v2560_v5 = vmul.f32 %v3077_v50, %v2482_v47  ;;  %v2561_v33 = vmul.f32 %v3077_v50, %v2484_v48  ;;  %v2585_v6 = vmul.f32 %v3078_v49, %v2482_v47  ;;  %v2586_v10 = vmul.f32 %v3078_v49, %v2484_v48 }
 0xebe   :  { %v2520_v7 = vrot.slane %v2510_v40, 1  ;;  %v2521_v8 = vrot.slane %v2511_v39, 1  ;;  %v2545_v9 = vrot.slane %v2535_v2, 2  ;;  %v2550_v12 = vadd.f32 %v2544_v63, %v2525_v43  ;;  %v2773_v2 = vld [vmem:[#allocation8 + $0xd8] sm:$0xff] }
 0xebf   :  { %v2499_v13 = vmul.f32 %v3074_v25, %v2482_v47  ;;  %v2546_v14 = vrot.slane %v2536_v4, 2  ;;  %v2570_v15 = vrot.slane %v2560_v5, 3  ;;  %v2571_v11 = vrot.slane %v2561_v33, 3  ;;  %v2772_v4 = vld [vmem:[#allocation8 + $0xa0] sm:$0xff]  ;;  %3385 = vmatprep.subr.mxu1 %v2773_v2  ;;  %v2771_v5 = vld [vmem:[#allocation8 + $0x68] sm:$0xff]  ;;  %v2770_v33 = vld [vmem:[#allocation8 + $0x30] sm:$0xff] }
 0xec0   :  { %v2522_v18 = vsel %vm2516_vm7, %v2520_v7, %v2521_v8  ;;  %v2610_v16 = vmul.f32 %v3079_v32, %v2482_v47  ;;  %v2611_v17 = vmul.f32 %v3079_v32, %v2484_v48  ;;  %v2616_v19 = vrot.slane %v2608_v61, 5  ;;  %3386 = vmatpush3.msra.mxu1 %v2773_v2 }
 0xec1   :  { %v2617_v20 = vrot.slane %v2609_v44, 5  ;;  %v2526_v21 = vadd.f32 %v2522_v18, %v2499_v13  ;;  %v2595_v52 = vrot.slane %v2585_v6, 4  ;;  %v2547_v50 = vsel %vm2541_vm8, %v2545_v9, %v2546_v14  ;;  %3387 = vmatprep.subr.mxu1 %v2772_v4  ;;  %v3084_v6 = vld [vmem:[%s4078_s6 + $0x8] ss:$0 sm:$0xff] }
 0xec2   :  { %v2596_v22 = vrot.slane %v2586_v10, 4  ;;  %v2634_v23 = vmul.f32 %v3080_v60, %v2482_v47  ;;  %v2635_v56 = vmul.f32 %v3080_v60, %v2484_v48  ;;  %v2641_v51 = vrot.slane %v2632_v46, 6  ;;  %3388 = vmatpush3.msra.mxu1 %v2772_v4  ;;  %v2883_v18 = vld [vmem:[#allocation9 + $0x78] sm:$0xff] }
 0xec3   :  { %v2551_v49 = vadd.f32 %v2547_v50, %v2526_v21  ;;  %v2575_v53 = vadd.f32 %v2569_v45, %v2550_v12  ;;  %v2594_v55 = vsel %vm2591_vm10, %v2592_v38, %v2593_v41  ;;  %v2642_v58 = vrot.slane %v2633_v0, 6  ;;  %3389 = vmatprep.subr.mxu1 %v2771_v5  ;;  %3396 = vmatprep.subr.mxu0 %v2883_v18 }
 0xec4   :  { %v2572_v1 = vsel %vm2566_vm9, %v2570_v15, %v2571_v11  ;;  %v2619_v3 = vrot.slane %v2610_v16, 5  ;;  %v2620_v24 = vrot.slane %v2611_v17, 5  ;;  %v2597_v27 = vsel %vm2591_vm10, %v2595_v52, %v2596_v22  ;;  %3390 = vmatpush3.msra.mxu1 %v2771_v5  ;;  %v2882_v11 = vld [vmem:[#allocation9 + $0x68] sm:$0xff]  ;;  %v2881_v16 = vld [vmem:[#allocation9 + $0x58] sm:$0xff] }
 0xec5   :  { %v2576_v25 = vadd.f32 %v2572_v1, %v2551_v49  ;;  %v2600_v26 = vadd.f32 %v2594_v55, %v2575_v53  ;;  %v2644_v28 = vrot.slane %v2634_v23, 6  ;;  %v2645_v29 = vrot.slane %v2635_v56, 6  ;;  %3391 = vmatprep.subr.mxu1 %v2770_v33  ;;  %v2876_v17 = vld [vmem:[#allocation9 + $0x8] sm:$0xff] }
 0xec6   :  { %v2618_v30 = vsel %vm2480_vm6, %v2616_v19, %v2617_v20  ;;  %v2621_v34 = vsel %vm2480_vm6, %v2619_v3, %v2620_v24  ;;  %v2643_v35 = vsel %vm2640_vm11, %v2641_v51, %v2642_v58  ;;  %3392 = vmatpush3.msra.mxu1 %v2770_v33  ;;  %v3087_v19 = vld [vmem:[%s4078_s6 + $0x9] ss:$0 sm:$0xff] }
 0xec7   :  { %v2601_v31 = vadd.f32 %v2597_v27, %v2576_v25  ;;  %v2624_v32 = vadd.f32 %v2618_v30, %v2600_v26  ;;  %v2646_v38 = vsel %vm2640_vm11, %v2644_v28, %v2645_v29  ;;  %v3094_v25 = vld [vmem:[%s4078_s6 + $0xa] ss:$0 sm:$0xff]  ;;  %s3665_s6 = smov [#allocation12]  }
 0xec8   :  { %s3002_s5 = sshll.u32 %s3665_s6, 4  ;;  %s3003_s5 = int_to_ptr.vmem [resolvable:$true] %s3002_s5 }
 0xec9   :  { %v2625_v60 = vadd.f32 %v2621_v34, %v2601_v31  ;;  %v2649_v37 = vadd.f32 %v2643_v35, %v2624_v32  ;;  %p3617_p12 = scmp.lt.s32.totalorder %s3003_s5, %s3003_s5 }
 0xecb   :  { %v2650_v41 = vadd.f32 %v2646_v38, %v2625_v60  ;;  %v2658_v42 = vadd.f32 %v3081_v36, %v2649_v37 }
 0xecd   :  { %v2659_v43 = vadd.f32 %v3081_v36, %v2650_v41  ;;  %v3082_v63 = vmul.f32 -1.442695, %v2658_v42  ;;  %v2988_v36 = vstv %s4080_s8  ;;  %s3612_s8 = scalar_lea.vmem %s3003_s5, 256 }
 0xece   :  { %p3613_p11 = scmp.ne.s32.totalorder %s3003_s5, %s3612_s8  ;;  %p3618_p13 = scmp.lt.s32.totalorder %s3612_s8, %s3612_s8 }
 0xecf   :  { %3492 = vpow2.f32 %v3082_v63  ;;  %v3083_v61 = vmul.f32 -1.442695, %v2659_v43 }
 0xed0   :  { %p3619_p0 = por %p3618_p13, %p3617_p12 }
 0xed1   :  { %3494 = vpow2.f32 %v3083_v61 }
 0xed2   :  { %p3620_p1 = pnand %p3619_p0, %p3613_p11 }
 0xedc   :  { %v3493_v44 = vpop.eup %3492 }
 0xedd   :  { %v2666_v45 = vadd.f32 1.0, %v3493_v44 }
 0xede   :  { %v3495_v46 = vpop.eup %3494 }
 0xedf   :  { %v2667_v47 = vadd.f32 1.0, %v3495_v46  ;;  %3496 = vrcp.f32 %v2666_v45 }
 0xee1   :  { %3498 = vrcp.f32 %v2667_v47 }
 0xeec   :  { %v3497_v48 = vpop.eup %3496 }
 0xeed   :  { %v2672_v0 = vmul.f32 %v3497_v48, %v2658_v42 }
 0xeee   :  { %v3499_v40 = vpop.eup %3498 }
 0xeef   :  { %3382 = vmatprep.mubr.msk.f32.mxu0 %vm122_vm0, %v2672_v0  ;;  %v2673_v39 = vmul.f32 %v3499_v40, %v2659_v43 }
 0xef1   :  { %3383 = vmatmul.mubr.msk.f32.vlgmr.msra.gmra.mxu0 %vm122_vm0, %v2673_v39 }
 0xef2   :  { %3397 = vmatpush3.msra.mxu0 %v2883_v18 }
 0xef3   :  { %3398 = vmatprep.subr.mxu0 %v2882_v11 }
 0xef4   :  { %3399 = vmatpush3.msra.mxu0 %v2882_v11 }
 0xef5   :  { %3400 = vmatprep.subr.mxu0 %v2881_v16 }
 0xef6   :  { %3401 = vmatpush3.msra.mxu0 %v2881_v16 }
 0xfb1   :  { %v3384_v7 = vpop.f32.mrf.mxu0 }
 0xfb2   :  { %v2763_v8 = vadd.f32 %v3384_v7, %v3084_v6 }
 0xfb3   :  { %v2757_v9 = vpop.f32.mrf.mxu0 }
 0xfb4   :  { %v2758_v10 = vadd.f32 %v3084_v6, %v2757_v9  ;;  %v2767_v12 = vmul.f32 %v2763_v8, %v4012_v62  ;;  %v2880_v62 = vld [vmem:[#allocation9 + $0x48] sm:$0xff] }
 0xfb5   :  { %3402 = vmatprep.subr.mxu0 %v2880_v62 }
 0xfb6   :  { %v2766_v13 = vmul.f32 %v2758_v10, %v4008_v57  ;;  %v2769_v15 = vadd.f32 %v2767_v12, %v4006_v54  ;;  %v2879_v57 = vld [vmem:[#allocation9 + $0x38] sm:$0xff]  ;;  %3403 = vmatpush3.msra.mxu0 %v2880_v62 }
 0xfb7   :  { %3404 = vmatprep.subr.mxu0 %v2879_v57  ;;  %v2877_v54 = vld [vmem:[#allocation9 + $0x18] sm:$0xff] }
 0xfb8   :  { %v2768_v14 = vadd.f32 %v2766_v13, %v4010_v59  ;;  %v2878_v59 = vld [vmem:[#allocation9 + $0x28] sm:$0xff]  ;;  %3405 = vmatpush3.msra.mxu0 %v2879_v57 }
 0xfb9   :  { %3406 = vmatprep.subr.mxu0 %v2878_v59 }
 0xfba   :  { %3393 = vmatprep.mubr.msk.f32.mxu1 %vm122_vm0, %v2768_v14  ;;  %3407 = vmatpush3.msra.mxu0 %v2878_v59 }
 0xfbb   :  { %3394 = vmatmul.mubr.msk.f32.vlgmr.msra.gmra.mxu1 %vm122_vm0, %v2769_v15  ;;  %3408 = vmatprep.subr.mxu0 %v2877_v54 }
 0xfbc   :  { %3409 = vmatpush3.msra.mxu0 %v2877_v54 }
 0xfbd   :  { %3410 = vmatprep.subr.mxu0 %v2876_v17 }
 0xfbe   :  { %3411 = vmatpush3.msra.mxu0 %v2876_v17 }
0x107b   :  { %v3395_v20 = vpop.f32.mrf.mxu1 }
0x107c   :  { %v2859_v21 = vadd.f32 %v3395_v20, %v3087_v19 }
0x107d   :  { %v2853_v52 = vpop.f32.mrf.mxu1 }
0x107e   :  { %v3091_v50 = vmul.f32 -1.442695, %v2859_v21  ;;  %v2854_v22 = vadd.f32 %v3087_v19, %v2853_v52 }
0x1080   :  { %3500 = vpow2.f32 %v3091_v50  ;;  %v3090_v23 = vmul.f32 -1.442695, %v2854_v22 }
0x1082   :  { %3502 = vpow2.f32 %v3090_v23 }
0x108d   :  { %v3501_v56 = vpop.eup %3500 }
0x108e   :  { %v2869_v51 = vadd.f32 1.0, %v3501_v56 }
0x108f   :  { %v3503_v49 = vpop.eup %3502 }
0x1090   :  { %v2868_v53 = vadd.f32 1.0, %v3503_v49  ;;  %3504 = vrcp.f32 %v2869_v51 }
0x1092   :  { %3506 = vrcp.f32 %v2868_v53 }
0x109d   :  { %v3505_v55 = vpop.eup %3504 }
0x109e   :  { %v2875_v3 = vmul.f32 %v3505_v55, %v2859_v21 }
0x109f   :  { %v3507_v58 = vpop.eup %3506 }
0x10a0   :  { %v2874_v1 = vmul.f32 %v3507_v58, %v2854_v22 }
0x10a2   :  { %3412 = vmatprep.mubr.msk.f32.mxu0 %vm226_vm1, %v2874_v1 }
0x10a3   :  { %3413 = vmatmul.mubr.msk.f32.vlgmr.msra.gmra.mxu0 %vm226_vm1, %v2875_v3 }
0x1163   :  { %v3414_v24 = vpop.f32.mrf.mxu0 }
0x1164   :  { %v2966_v26 = vadd.f32 %v3414_v24, %v2769_v15 }
0x1165   :  { %v2956_v27 = vpop.f32.mrf.mxu0 }
0x1166   :  { %v2975_v28 = vadd.f32 %v3094_v25, %v2966_v26  ;;  %v2965_v29 = vadd.f32 %v2956_v27, %v2768_v14 }
0x1168   :  { %v2974_v30 = vadd.f32 %v3094_v25, %v2965_v29  ;;  %v2977_v31 = vmul.f32 %v2975_v28, %v2975_v28 }
0x116a   :  { %v2981_v32 = vsel %vm122_vm0, %v2977_v31, 0.0  ;;  %v2976_v34 = vmul.f32 %v2974_v30, %v2974_v30 }
0x116b   :  { %2982 = vadd.xlane.f32.xlu1 %v2981_v32 }
0x116c   :  { %v2978_v35 = vsel %vm122_vm0, %v2976_v34, 0.0 }
0x116d   :  { %2979 = vadd.xlane.f32.xlu0 %v2978_v35 }
0x11f4   :  { %v2983_v60 = vpop.xlane.xlu1 %2982 }
0x11f5   :  { %v2986_v37 = vmul.f32 0.03125, %v2983_v60 }
0x11f6   :  { %v2980_v38 = vpop.xlane.xlu0 %2979 }
0x11f7   :  { %v2990_v41 = vadd.f32 %v2988_v36, %v2986_v37  ;;  %v2985_v42 = vmul.f32 0.03125, %v2980_v38 }
0x11f9   :  { %3508 = vrsqrt.f32 %v2990_v41  ;;  %v2989_v43 = vadd.f32 %v2988_v36, %v2985_v42 }
0x11fb   :  { %3510 = vrsqrt.f32 %v2989_v43 }
0x1206   :  { %v3509_v63 = vpop.eup %3508 }
0x1207   :  { %v2994_v61 = vmul.f32 %v3509_v63, %v2975_v28 }
0x1208   :  { %v3511_v44 = vpop.eup %3510 }
0x1209   :  { %v2993_v45 = vmul.f32 %v3511_v44, %v2974_v30  ;;  %2996 = vst.msk [vmem:[#allocation12 + $0x8] sm:$0xff] %vm122_vm0, %v2994_v61 }
0x120b   :  { %2995 = vst.msk [vmem:[#allocation12] sm:$0xff] %vm122_vm0, %v2993_v45 }
0x120c   :  { %3623 = shalt.err (!%p3620_p1)
}
0x120d   :  { %s3666_s30 = smov 128  }
0x120e   :  { %3008 = dma.vmem_to_hbm [thread:$0]  %s3003_s5, 256, %s4081_s9, [#allocation5], %s3666_s30, %s3666_s30, %s3662_s16  }
0x120f   :  { %3638 = dma.done.wait [#allocation5], 256  }
0x1210   :  { %3639 = vsyncadd [#allocation5], 4294967040 }
0x1211   :  { %3012 = vsyncpa [#allocation4], 1 }
0x1212   :  { %3013 = vsyncpa [#allocation7], 1 }
0x1213   :  { %3014 = vsyncpa [#allocation10], 1 }
0x1214   :  { %3015 = vsyncpa [#allocation5], 1 }

</bundles_post_ra>
